<compile_context>
chip_gen: v6e
topology: v6e:2x2x1
jax: 0.10.0
libtpu: 0.0.40
codegen_flags: <defaults>
</compile_context>

<pallas_src>
import jax
import jax.numpy as jnp
from jax import lax
from jax.experimental import pallas as pl
from jax.experimental.pallas import tpu as pltpu


_UNROLL_MAX_STEPS = 64   # fully unroll the time loop when S is small & static
_LANE = 128              # TPU lane width: batch-tile granularity & head padding


def rnn_classifier_kernel(pre_ref, whh_ref, wfct_ref, bfc_ref, out_ref):
    """Fused tanh-RNN recurrence + temporal sum + classifier head, one batch tile.

    Transposed layout: batch fills the 128-lane axis, hidden lives in sublanes.

      pre_ref  : (S, H, TB)  gathered projected inputs  proj[token] = x@W_ih + b
      whh_ref  : (H, H)      hidden->hidden weight in torch layout W_hh[j, k]
      wfct_ref : (Cpad, H)   classifier weight^T, pre-scaled by 1/S, zero-padded
      bfc_ref  : (Cpad, 1)   classifier bias (lane-broadcast in the epilogue)
      out_ref  : (Cpad, TB)  logits tile (lane-dense store)
    """
    S, H, TB = pre_ref.shape

    # Loop-invariant weight columns, broadcast to (H, TB) ONCE per grid step
    # (hoisted: JAX does not CSE broadcast_in_dim inside the unrolled S-loop).
    whh = whh_ref[...]
    wb = [jnp.broadcast_to(whh[:, k:k + 1], (H, TB)) for k in range(H)]

    def cell(h, pre_t):
        # h_new[j, b] = tanh(pre_t[j, b] + sum_k W_hh[j, k] * h[k, b])
        # Independent VPU multiplies + log-depth tree reduction: the dependent
        # add chain on the serial path is ~4 deep instead of H deep.
        vals = [pre_t] + [wb[k] * h[k:k + 1, :] for k in range(H)]
        while len(vals) > 1:
            nxt = [vals[i] + vals[i + 1] for i in range(0, len(vals) - 1, 2)]
            if len(vals) % 2:
                nxt.append(vals[-1])
            vals = nxt
        return jnp.tanh(vals[0])   # EUP

    h0 = jnp.zeros((H, TB), jnp.float32)
    s0 = jnp.zeros((H, TB), jnp.float32)

    if S <= _UNROLL_MAX_STEPS:
        # Fully unrolled: static leading-axis slices, LLO overlaps step t's
        # tanh with step t+1's loads/fmas.
        h, hsum = h0, s0
        for t in range(S):
            h = cell(h, pre_ref[t].astype(jnp.float32))
            hsum = hsum + h
    else:
        def step(t, carry):
            h, hsum = carry
            h = cell(h, pre_ref[t].astype(jnp.float32))
            return h, hsum + h

        h, hsum = lax.fori_loop(0, S, step, (h0, s0))

    # Classifier head on the MXU: (Cpad, H) @ (H, TB).  1/S is already folded
    # into wfct, so this IS mean-over-time + Linear.  Lane-dense (Cpad, TB) store.
    out_ref[...] = (
        jnp.dot(wfct_ref[...], hsum, preferred_element_type=jnp.float32)
        + bfc_ref[...]
    )


def init_params(key, vocab_size=8240, embed_dim=40, hidden_dim=10, num_class=4):
    """Deterministic init mirroring RNNClassifier.init_weights (uniform ±0.5, zero biases)."""
    k_emb, k_wih, k_whh, k_wfc = jax.random.split(key, 4)
    initrange = 0.5
    u = lambda k, shape: jax.random.uniform(
        k, shape, jnp.float32, -initrange, initrange
    )
    return {
        "embedding": u(k_emb, (vocab_size, embed_dim)),
        # stored already transposed relative to torch: (in, out)
        "wih": u(k_wih, (embed_dim, hidden_dim)),
        "whh": u(k_whh, (hidden_dim, hidden_dim)),
        "b_ih": jnp.zeros((hidden_dim,), jnp.float32),
        "b_hh": jnp.zeros((hidden_dim,), jnp.float32),
        "wfc": u(k_wfc, (hidden_dim, num_class)),
        "b_fc": jnp.zeros((num_class,), jnp.float32),
    }


def rnn_classifier_forward(tokens, params, *, batch_tile=128):
    """tokens: (B, S) int32 indices -> logits (B, num_class) f32.

    batch_tile: rows per grid step; rounded up to a multiple of 128 because the
                batch dimension fills the 128-lane axis of the recurrence.
    """
    H = params["whh"].shape[0]
    C = params["wfc"].shape[1]
    B, S = tokens.shape

    TB = max(_LANE, ((int(batch_tile) + _LANE - 1) // _LANE) * _LANE)
    B_pad = ((B + TB - 1) // TB) * TB
    C_pad = max(_LANE, ((C + _LANE - 1) // _LANE) * _LANE)

    # ---- One-time projected-input table: x_t @ W_ih + (b_ih + b_hh). ----
    # (vocab, H) = (8240, 10) f32 ~ 330 KB.  Gathering this instead of the
    # (vocab, E) embedding shrinks streamed HBM traffic 4x and removes the
    # in-kernel projection matmul.  For inference it can be cached across calls.
    b = (params["b_ih"] + params["b_hh"]).astype(jnp.float32)
    proj_table = (
        jnp.dot(params["embedding"].astype(jnp.float32),
                params["wih"].astype(jnp.float32),
                precision=lax.Precision.HIGHEST)
        + b
    )

    # Pad batch with token 0 (padded rows run in otherwise-idle lanes and are
    # sliced away) and gather time-major in the kernel's transposed layout:
    # (S, H, B_pad) with batch minor so it lands on the lane axis.
    tokens_p = tokens if B_pad == B else jnp.pad(tokens, ((0, B_pad - B), (0, 0)))
    pre = jnp.swapaxes(proj_table[tokens_p.T], 1, 2)       # (S, H, B_pad) f32

    # W_hh in torch layout (W_hh[j, k]) so the kernel's per-k weight column is
    # a plain minor-dim slice + lane broadcast.
    whh_t = params["whh"].astype(jnp.float32).T            # (H, H)

    # Classifier head: transpose, fold 1/S (temporal mean), zero-pad to 128
    # rows so the output store is a full lane-dense (Cpad, TB) vst.
    wfct = jnp.zeros((C_pad, H), jnp.float32).at[:C, :].set(
        params["wfc"].astype(jnp.float32).T * (1.0 / S))
    bfc = jnp.zeros((C_pad, 1), jnp.float32).at[:C, 0].set(
        params["b_fc"].astype(jnp.float32))

    grid = (B_pad // TB,)
    out = pl.pallas_call(
        rnn_classifier_kernel,
        out_shape=jax.ShapeDtypeStruct((C_pad, B_pad), jnp.float32),
        grid_spec=pltpu.PrefetchScalarGridSpec(
            num_scalar_prefetch=0,
            grid=grid,
            in_specs=[
                # streamed activations: batch-tiled, auto double-buffered DMA
                pl.BlockSpec((S, H, TB), lambda i: (0, 0, i)),
                # tiny weights: resident across all grid steps
                pl.BlockSpec((H, H), lambda i: (0, 0)),
                pl.BlockSpec((C_pad, H), lambda i: (0, 0)),
                pl.BlockSpec((C_pad, 1), lambda i: (0, 0)),
            ],
            out_specs=pl.BlockSpec((C_pad, TB), lambda i: (0, i)),
        ),
        compiler_params=pltpu.CompilerParams(
            # Batch axis is embarrassingly parallel (megacore / v7x 2-TC split;
            # with TB=128 the grid is >=2 whenever B >= 256).
            dimension_semantics=("parallel",),
            # Per-tile footprint ~ 2 * S*H*TB*4 B (double-buffered pre block)
            # + <1 MB resident weights/output, so 32 MiB is ample on v5e/v6e/v7x
            # for any realistic S.
            # TODO(synk): for S >~ 3000 add a time-chunk grid axis (or
            # emit_pipeline over S) to stay inside v7x's 64 MiB physical VMEM.
            vmem_limit_bytes=32 * 1024 * 1024,
        ),
    )(pre, whh_t, wfct, bfc)

    return out[:C, :B].T


def _reference_forward(tokens, params):
    """Pure-JAX reference matching the PyTorch semantics (for sanity check)."""
    emb = params["embedding"][tokens]                      # (B, S, E)
    b = params["b_ih"] + params["b_hh"]
    wih, whh = params["wih"], params["whh"]

    def step(h, xt):
        rec = jnp.sum(h[:, :, None] * whh[None, :, :], axis=1)   # == h @ whh (exact f32)
        proj = jnp.dot(xt, wih, precision=lax.Precision.HIGHEST)
        h_new = jnp.tanh(proj + rec + b)
        return h_new, h_new

    B = tokens.shape[0]
    H = whh.shape[0]
    h0 = jnp.zeros((B, H), jnp.float32)
    _, hs = lax.scan(step, h0, jnp.transpose(emb, (1, 0, 2)))    # (S, B, H)
    mean_h = jnp.mean(hs, axis=0)
    return jnp.dot(mean_h, params["wfc"], precision=lax.Precision.HIGHEST) + params["b_fc"]


if __name__ == "__main__":
    key = jax.random.PRNGKey(0)
    k_params, k_tok, k_tok2 = jax.random.split(key, 3)

    VOCAB, EMBED, HIDDEN, NCLASS = 8240, 40, 10, 4
    B, S = 2, 8

    params = init_params(k_params, VOCAB, EMBED, HIDDEN, NCLASS)
    tokens = jax.random.randint(k_tok, (B, S), 0, VOCAB, dtype=jnp.int32)

    # Short sequence -> fully-unrolled in-kernel time loop.
    logits = rnn_classifier_forward(tokens, params)
    jax.block_until_ready(logits)
    ref = _reference_forward(tokens, params)
    assert logits.shape == (B, NCLASS)
    assert jnp.allclose(logits, ref, atol=2e-4, rtol=2e-4), (
        "max |diff| =", float(jnp.max(jnp.abs(logits - ref))))

    # Longer sequence -> exercises the fori_loop path of the time loop.
    S2 = 96
    tokens2 = jax.random.randint(k_tok2, (B, S2), 0, VOCAB, dtype=jnp.int32)
    logits2 = rnn_classifier_forward(tokens2, params)
    jax.block_until_ready(logits2)
    ref2 = _reference_forward(tokens2, params)
    assert logits2.shape == (B, NCLASS)
    assert jnp.allclose(logits2, ref2, atol=5e-4, rtol=5e-4), (
        "max |diff| =", float(jnp.max(jnp.abs(logits2 - ref2))))

    print("KERNEL_OK")
</pallas_src>

<mosaic_0001>
module attributes {stable_mosaic.version = 11 : i64} {
  func.func @rnn_classifier_kernel(%arg0: i32, %arg1: memref<8x10x128xf32, #tpu.memory_space<vmem>>, %arg2: memref<10x10xf32, #tpu.memory_space<vmem>>, %arg3: memref<128x10xf32, #tpu.memory_space<vmem>>, %arg4: memref<128x1xf32, #tpu.memory_space<vmem>>, %arg5: memref<128x128xf32, #tpu.memory_space<vmem>>) attributes {dimension_semantics = [#tpu.dimension_semantics<parallel>], iteration_bounds = array<i64: 1>, scalar_prefetch = 0 : i64, scratch_operands = 0 : i64, tpu.core_type = #tpu.core_type<tc>, window_params = [{transform_indices = @transform_0, window_bounds = array<i64: 8, 10, 128>}, {pipeline_mode = #tpu.pipeline_mode<synchronous>, transform_indices = @transform_1, window_bounds = array<i64: 10, 10>}, {pipeline_mode = #tpu.pipeline_mode<synchronous>, transform_indices = @transform_2, window_bounds = array<i64: 128, 10>}, {pipeline_mode = #tpu.pipeline_mode<synchronous>, transform_indices = @transform_3, window_bounds = array<i64: 128, 1>}, {transform_indices = @transform_4, window_bounds = array<i64: 128, 128>}]} {
    %c0 = arith.constant 0 : index
    %c0_0 = arith.constant 0 : index
    %0 = vector.load %arg2[%c0, %c0_0] : memref<10x10xf32, #tpu.memory_space<vmem>>, vector<10x10xf32>
    %1 = vector.extract_strided_slice %0 {offsets = [0, 0], sizes = [10, 1], strides = [1, 1]} : vector<10x10xf32> to vector<10x1xf32>
    %2 = vector.shape_cast %1 : vector<10x1xf32> to vector<10x1xf32>
    %3 = vector.broadcast %2 : vector<10x1xf32> to vector<10x128xf32>
    %4 = vector.extract_strided_slice %0 {offsets = [0, 1], sizes = [10, 1], strides = [1, 1]} : vector<10x10xf32> to vector<10x1xf32>
    %5 = vector.shape_cast %4 : vector<10x1xf32> to vector<10x1xf32>
    %6 = vector.broadcast %5 : vector<10x1xf32> to vector<10x128xf32>
    %7 = vector.extract_strided_slice %0 {offsets = [0, 2], sizes = [10, 1], strides = [1, 1]} : vector<10x10xf32> to vector<10x1xf32>
    %8 = vector.shape_cast %7 : vector<10x1xf32> to vector<10x1xf32>
    %9 = vector.broadcast %8 : vector<10x1xf32> to vector<10x128xf32>
    %10 = vector.extract_strided_slice %0 {offsets = [0, 3], sizes = [10, 1], strides = [1, 1]} : vector<10x10xf32> to vector<10x1xf32>
    %11 = vector.shape_cast %10 : vector<10x1xf32> to vector<10x1xf32>
    %12 = vector.broadcast %11 : vector<10x1xf32> to vector<10x128xf32>
    %13 = vector.extract_strided_slice %0 {offsets = [0, 4], sizes = [10, 1], strides = [1, 1]} : vector<10x10xf32> to vector<10x1xf32>
    %14 = vector.shape_cast %13 : vector<10x1xf32> to vector<10x1xf32>
    %15 = vector.broadcast %14 : vector<10x1xf32> to vector<10x128xf32>
    %16 = vector.extract_strided_slice %0 {offsets = [0, 5], sizes = [10, 1], strides = [1, 1]} : vector<10x10xf32> to vector<10x1xf32>
    %17 = vector.shape_cast %16 : vector<10x1xf32> to vector<10x1xf32>
    %18 = vector.broadcast %17 : vector<10x1xf32> to vector<10x128xf32>
    %19 = vector.extract_strided_slice %0 {offsets = [0, 6], sizes = [10, 1], strides = [1, 1]} : vector<10x10xf32> to vector<10x1xf32>
    %20 = vector.shape_cast %19 : vector<10x1xf32> to vector<10x1xf32>
    %21 = vector.broadcast %20 : vector<10x1xf32> to vector<10x128xf32>
    %22 = vector.extract_strided_slice %0 {offsets = [0, 7], sizes = [10, 1], strides = [1, 1]} : vector<10x10xf32> to vector<10x1xf32>
    %23 = vector.shape_cast %22 : vector<10x1xf32> to vector<10x1xf32>
    %24 = vector.broadcast %23 : vector<10x1xf32> to vector<10x128xf32>
    %25 = vector.extract_strided_slice %0 {offsets = [0, 8], sizes = [10, 1], strides = [1, 1]} : vector<10x10xf32> to vector<10x1xf32>
    %26 = vector.shape_cast %25 : vector<10x1xf32> to vector<10x1xf32>
    %27 = vector.broadcast %26 : vector<10x1xf32> to vector<10x128xf32>
    %28 = vector.extract_strided_slice %0 {offsets = [0, 9], sizes = [10, 1], strides = [1, 1]} : vector<10x10xf32> to vector<10x1xf32>
    %29 = vector.shape_cast %28 : vector<10x1xf32> to vector<10x1xf32>
    %30 = vector.broadcast %29 : vector<10x1xf32> to vector<10x128xf32>
    %cst = arith.constant 0.000000e+00 : f32
    %31 = vector.broadcast %cst : f32 to vector<10x128xf32>
    %cst_1 = arith.constant 0.000000e+00 : f32
    %32 = vector.broadcast %cst_1 : f32 to vector<10x128xf32>
    %c0_2 = arith.constant 0 : index
    %c0_3 = arith.constant 0 : index
    %c0_4 = arith.constant 0 : index
    %33 = vector.load %arg1[%c0_2, %c0_3, %c0_4] : memref<8x10x128xf32, #tpu.memory_space<vmem>>, vector<1x10x128xf32>
    %34 = vector.shape_cast %33 : vector<1x10x128xf32> to vector<10x128xf32>
    %35 = vector.extract_strided_slice %31 {offsets = [0, 0], sizes = [1, 128], strides = [1, 1]} : vector<10x128xf32> to vector<1x128xf32>
    %36 = vector.broadcast %35 : vector<1x128xf32> to vector<10x128xf32>
    %37 = arith.mulf %3, %36 : vector<10x128xf32>
    %38 = vector.extract_strided_slice %31 {offsets = [1, 0], sizes = [1, 128], strides = [1, 1]} : vector<10x128xf32> to vector<1x128xf32>
    %39 = vector.broadcast %38 : vector<1x128xf32> to vector<10x128xf32>
    %40 = arith.mulf %6, %39 : vector<10x128xf32>
    %41 = vector.extract_strided_slice %31 {offsets = [2, 0], sizes = [1, 128], strides = [1, 1]} : vector<10x128xf32> to vector<1x128xf32>
    %42 = vector.broadcast %41 : vector<1x128xf32> to vector<10x128xf32>
    %43 = arith.mulf %9, %42 : vector<10x128xf32>
    %44 = vector.extract_strided_slice %31 {offsets = [3, 0], sizes = [1, 128], strides = [1, 1]} : vector<10x128xf32> to vector<1x128xf32>
    %45 = vector.broadcast %44 : vector<1x128xf32> to vector<10x128xf32>
    %46 = arith.mulf %12, %45 : vector<10x128xf32>
    %47 = vector.extract_strided_slice %31 {offsets = [4, 0], sizes = [1, 128], strides = [1, 1]} : vector<10x128xf32> to vector<1x128xf32>
    %48 = vector.broadcast %47 : vector<1x128xf32> to vector<10x128xf32>
    %49 = arith.mulf %15, %48 : vector<10x128xf32>
    %50 = vector.extract_strided_slice %31 {offsets = [5, 0], sizes = [1, 128], strides = [1, 1]} : vector<10x128xf32> to vector<1x128xf32>
    %51 = vector.broadcast %50 : vector<1x128xf32> to vector<10x128xf32>
    %52 = arith.mulf %18, %51 : vector<10x128xf32>
    %53 = vector.extract_strided_slice %31 {offsets = [6, 0], sizes = [1, 128], strides = [1, 1]} : vector<10x128xf32> to vector<1x128xf32>
    %54 = vector.broadcast %53 : vector<1x128xf32> to vector<10x128xf32>
    %55 = arith.mulf %21, %54 : vector<10x128xf32>
    %56 = vector.extract_strided_slice %31 {offsets = [7, 0], sizes = [1, 128], strides = [1, 1]} : vector<10x128xf32> to vector<1x128xf32>
    %57 = vector.broadcast %56 : vector<1x128xf32> to vector<10x128xf32>
    %58 = arith.mulf %24, %57 : vector<10x128xf32>
    %59 = vector.extract_strided_slice %31 {offsets = [8, 0], sizes = [1, 128], strides = [1, 1]} : vector<10x128xf32> to vector<1x128xf32>
    %60 = vector.broadcast %59 : vector<1x128xf32> to vector<10x128xf32>
    %61 = arith.mulf %27, %60 : vector<10x128xf32>
    %62 = vector.extract_strided_slice %31 {offsets = [9, 0], sizes = [1, 128], strides = [1, 1]} : vector<10x128xf32> to vector<1x128xf32>
    %63 = vector.broadcast %62 : vector<1x128xf32> to vector<10x128xf32>
    %64 = arith.mulf %30, %63 : vector<10x128xf32>
    %65 = arith.addf %34, %37 : vector<10x128xf32>
    %66 = arith.addf %40, %43 : vector<10x128xf32>
    %67 = arith.addf %46, %49 : vector<10x128xf32>
    %68 = arith.addf %52, %55 : vector<10x128xf32>
    %69 = arith.addf %58, %61 : vector<10x128xf32>
    %70 = arith.addf %65, %66 : vector<10x128xf32>
    %71 = arith.addf %67, %68 : vector<10x128xf32>
    %72 = arith.addf %69, %64 : vector<10x128xf32>
    %73 = arith.addf %70, %71 : vector<10x128xf32>
    %74 = arith.addf %73, %72 : vector<10x128xf32>
    %75 = math.tanh %74 : vector<10x128xf32>
    %76 = arith.addf %32, %75 : vector<10x128xf32>
    %c1 = arith.constant 1 : index
    %c0_5 = arith.constant 0 : index
    %c0_6 = arith.constant 0 : index
    %77 = vector.load %arg1[%c1, %c0_5, %c0_6] : memref<8x10x128xf32, #tpu.memory_space<vmem>>, vector<1x10x128xf32>
    %78 = vector.shape_cast %77 : vector<1x10x128xf32> to vector<10x128xf32>
    %79 = vector.extract_strided_slice %75 {offsets = [0, 0], sizes = [1, 128], strides = [1, 1]} : vector<10x128xf32> to vector<1x128xf32>
    %80 = vector.broadcast %79 : vector<1x128xf32> to vector<10x128xf32>
    %81 = arith.mulf %3, %80 : vector<10x128xf32>
    %82 = vector.extract_strided_slice %75 {offsets = [1, 0], sizes = [1, 128], strides = [1, 1]} : vector<10x128xf32> to vector<1x128xf32>
    %83 = vector.broadcast %82 : vector<1x128xf32> to vector<10x128xf32>
    %84 = arith.mulf %6, %83 : vector<10x128xf32>
    %85 = vector.extract_strided_slice %75 {offsets = [2, 0], sizes = [1, 128], strides = [1, 1]} : vector<10x128xf32> to vector<1x128xf32>
    %86 = vector.broadcast %85 : vector<1x128xf32> to vector<10x128xf32>
    %87 = arith.mulf %9, %86 : vector<10x128xf32>
    %88 = vector.extract_strided_slice %75 {offsets = [3, 0], sizes = [1, 128], strides = [1, 1]} : vector<10x128xf32> to vector<1x128xf32>
    %89 = vector.broadcast %88 : vector<1x128xf32> to vector<10x128xf32>
    %90 = arith.mulf %12, %89 : vector<10x128xf32>
    %91 = vector.extract_strided_slice %75 {offsets = [4, 0], sizes = [1, 128], strides = [1, 1]} : vector<10x128xf32> to vector<1x128xf32>
    %92 = vector.broadcast %91 : vector<1x128xf32> to vector<10x128xf32>
    %93 = arith.mulf %15, %92 : vector<10x128xf32>
    %94 = vector.extract_strided_slice %75 {offsets = [5, 0], sizes = [1, 128], strides = [1, 1]} : vector<10x128xf32> to vector<1x128xf32>
    %95 = vector.broadcast %94 : vector<1x128xf32> to vector<10x128xf32>
    %96 = arith.mulf %18, %95 : vector<10x128xf32>
    %97 = vector.extract_strided_slice %75 {offsets = [6, 0], sizes = [1, 128], strides = [1, 1]} : vector<10x128xf32> to vector<1x128xf32>
    %98 = vector.broadcast %97 : vector<1x128xf32> to vector<10x128xf32>
    %99 = arith.mulf %21, %98 : vector<10x128xf32>
    %100 = vector.extract_strided_slice %75 {offsets = [7, 0], sizes = [1, 128], strides = [1, 1]} : vector<10x128xf32> to vector<1x128xf32>
    %101 = vector.broadcast %100 : vector<1x128xf32> to vector<10x128xf32>
    %102 = arith.mulf %24, %101 : vector<10x128xf32>
    %103 = vector.extract_strided_slice %75 {offsets = [8, 0], sizes = [1, 128], strides = [1, 1]} : vector<10x128xf32> to vector<1x128xf32>
    %104 = vector.broadcast %103 : vector<1x128xf32> to vector<10x128xf32>
    %105 = arith.mulf %27, %104 : vector<10x128xf32>
    %106 = vector.extract_strided_slice %75 {offsets = [9, 0], sizes = [1, 128], strides = [1, 1]} : vector<10x128xf32> to vector<1x128xf32>
    %107 = vector.broadcast %106 : vector<1x128xf32> to vector<10x128xf32>
    %108 = arith.mulf %30, %107 : vector<10x128xf32>
    %109 = arith.addf %78, %81 : vector<10x128xf32>
    %110 = arith.addf %84, %87 : vector<10x128xf32>
    %111 = arith.addf %90, %93 : vector<10x128xf32>
    %112 = arith.addf %96, %99 : vector<10x128xf32>
    %113 = arith.addf %102, %105 : vector<10x128xf32>
    %114 = arith.addf %109, %110 : vector<10x128xf32>
    %115 = arith.addf %111, %112 : vector<10x128xf32>
    %116 = arith.addf %113, %108 : vector<10x128xf32>
    %117 = arith.addf %114, %115 : vector<10x128xf32>
    %118 = arith.addf %117, %116 : vector<10x128xf32>
    %119 = math.tanh %118 : vector<10x128xf32>
    %120 = arith.addf %76, %119 : vector<10x128xf32>
    %c2 = arith.constant 2 : index
    %c0_7 = arith.constant 0 : index
    %c0_8 = arith.constant 0 : index
    %121 = vector.load %arg1[%c2, %c0_7, %c0_8] : memref<8x10x128xf32, #tpu.memory_space<vmem>>, vector<1x10x128xf32>
    %122 = vector.shape_cast %121 : vector<1x10x128xf32> to vector<10x128xf32>
    %123 = vector.extract_strided_slice %119 {offsets = [0, 0], sizes = [1, 128], strides = [1, 1]} : vector<10x128xf32> to vector<1x128xf32>
    %124 = vector.broadcast %123 : vector<1x128xf32> to vector<10x128xf32>
    %125 = arith.mulf %3, %124 : vector<10x128xf32>
    %126 = vector.extract_strided_slice %119 {offsets = [1, 0], sizes = [1, 128], strides = [1, 1]} : vector<10x128xf32> to vector<1x128xf32>
    %127 = vector.broadcast %126 : vector<1x128xf32> to vector<10x128xf32>
    %128 = arith.mulf %6, %127 : vector<10x128xf32>
    %129 = vector.extract_strided_slice %119 {offsets = [2, 0], sizes = [1, 128], strides = [1, 1]} : vector<10x128xf32> to vector<1x128xf32>
    %130 = vector.broadcast %129 : vector<1x128xf32> to vector<10x128xf32>
    %131 = arith.mulf %9, %130 : vector<10x128xf32>
    %132 = vector.extract_strided_slice %119 {offsets = [3, 0], sizes = [1, 128], strides = [1, 1]} : vector<10x128xf32> to vector<1x128xf32>
    %133 = vector.broadcast %132 : vector<1x128xf32> to vector<10x128xf32>
    %134 = arith.mulf %12, %133 : vector<10x128xf32>
    %135 = vector.extract_strided_slice %119 {offsets = [4, 0], sizes = [1, 128], strides = [1, 1]} : vector<10x128xf32> to vector<1x128xf32>
    %136 = vector.broadcast %135 : vector<1x128xf32> to vector<10x128xf32>
    %137 = arith.mulf %15, %136 : vector<10x128xf32>
    %138 = vector.extract_strided_slice %119 {offsets = [5, 0], sizes = [1, 128], strides = [1, 1]} : vector<10x128xf32> to vector<1x128xf32>
    %139 = vector.broadcast %138 : vector<1x128xf32> to vector<10x128xf32>
    %140 = arith.mulf %18, %139 : vector<10x128xf32>
    %141 = vector.extract_strided_slice %119 {offsets = [6, 0], sizes = [1, 128], strides = [1, 1]} : vector<10x128xf32> to vector<1x128xf32>
    %142 = vector.broadcast %141 : vector<1x128xf32> to vector<10x128xf32>
    %143 = arith.mulf %21, %142 : vector<10x128xf32>
    %144 = vector.extract_strided_slice %119 {offsets = [7, 0], sizes = [1, 128], strides = [1, 1]} : vector<10x128xf32> to vector<1x128xf32>
    %145 = vector.broadcast %144 : vector<1x128xf32> to vector<10x128xf32>
    %146 = arith.mulf %24, %145 : vector<10x128xf32>
    %147 = vector.extract_strided_slice %119 {offsets = [8, 0], sizes = [1, 128], strides = [1, 1]} : vector<10x128xf32> to vector<1x128xf32>
    %148 = vector.broadcast %147 : vector<1x128xf32> to vector<10x128xf32>
    %149 = arith.mulf %27, %148 : vector<10x128xf32>
    %150 = vector.extract_strided_slice %119 {offsets = [9, 0], sizes = [1, 128], strides = [1, 1]} : vector<10x128xf32> to vector<1x128xf32>
    %151 = vector.broadcast %150 : vector<1x128xf32> to vector<10x128xf32>
    %152 = arith.mulf %30, %151 : vector<10x128xf32>
    %153 = arith.addf %122, %125 : vector<10x128xf32>
    %154 = arith.addf %128, %131 : vector<10x128xf32>
    %155 = arith.addf %134, %137 : vector<10x128xf32>
    %156 = arith.addf %140, %143 : vector<10x128xf32>
    %157 = arith.addf %146, %149 : vector<10x128xf32>
    %158 = arith.addf %153, %154 : vector<10x128xf32>
    %159 = arith.addf %155, %156 : vector<10x128xf32>
    %160 = arith.addf %157, %152 : vector<10x128xf32>
    %161 = arith.addf %158, %159 : vector<10x128xf32>
    %162 = arith.addf %161, %160 : vector<10x128xf32>
    %163 = math.tanh %162 : vector<10x128xf32>
    %164 = arith.addf %120, %163 : vector<10x128xf32>
    %c3 = arith.constant 3 : index
    %c0_9 = arith.constant 0 : index
    %c0_10 = arith.constant 0 : index
    %165 = vector.load %arg1[%c3, %c0_9, %c0_10] : memref<8x10x128xf32, #tpu.memory_space<vmem>>, vector<1x10x128xf32>
    %166 = vector.shape_cast %165 : vector<1x10x128xf32> to vector<10x128xf32>
    %167 = vector.extract_strided_slice %163 {offsets = [0, 0], sizes = [1, 128], strides = [1, 1]} : vector<10x128xf32> to vector<1x128xf32>
    %168 = vector.broadcast %167 : vector<1x128xf32> to vector<10x128xf32>
    %169 = arith.mulf %3, %168 : vector<10x128xf32>
    %170 = vector.extract_strided_slice %163 {offsets = [1, 0], sizes = [1, 128], strides = [1, 1]} : vector<10x128xf32> to vector<1x128xf32>
    %171 = vector.broadcast %170 : vector<1x128xf32> to vector<10x128xf32>
    %172 = arith.mulf %6, %171 : vector<10x128xf32>
    %173 = vector.extract_strided_slice %163 {offsets = [2, 0], sizes = [1, 128], strides = [1, 1]} : vector<10x128xf32> to vector<1x128xf32>
    %174 = vector.broadcast %173 : vector<1x128xf32> to vector<10x128xf32>
    %175 = arith.mulf %9, %174 : vector<10x128xf32>
    %176 = vector.extract_strided_slice %163 {offsets = [3, 0], sizes = [1, 128], strides = [1, 1]} : vector<10x128xf32> to vector<1x128xf32>
    %177 = vector.broadcast %176 : vector<1x128xf32> to vector<10x128xf32>
    %178 = arith.mulf %12, %177 : vector<10x128xf32>
    %179 = vector.extract_strided_slice %163 {offsets = [4, 0], sizes = [1, 128], strides = [1, 1]} : vector<10x128xf32> to vector<1x128xf32>
    %180 = vector.broadcast %179 : vector<1x128xf32> to vector<10x128xf32>
    %181 = arith.mulf %15, %180 : vector<10x128xf32>
    %182 = vector.extract_strided_slice %163 {offsets = [5, 0], sizes = [1, 128], strides = [1, 1]} : vector<10x128xf32> to vector<1x128xf32>
    %183 = vector.broadcast %182 : vector<1x128xf32> to vector<10x128xf32>
    %184 = arith.mulf %18, %183 : vector<10x128xf32>
    %185 = vector.extract_strided_slice %163 {offsets = [6, 0], sizes = [1, 128], strides = [1, 1]} : vector<10x128xf32> to vector<1x128xf32>
    %186 = vector.broadcast %185 : vector<1x128xf32> to vector<10x128xf32>
    %187 = arith.mulf %21, %186 : vector<10x128xf32>
    %188 = vector.extract_strided_slice %163 {offsets = [7, 0], sizes = [1, 128], strides = [1, 1]} : vector<10x128xf32> to vector<1x128xf32>
    %189 = vector.broadcast %188 : vector<1x128xf32> to vector<10x128xf32>
    %190 = arith.mulf %24, %189 : vector<10x128xf32>
    %191 = vector.extract_strided_slice %163 {offsets = [8, 0], sizes = [1, 128], strides = [1, 1]} : vector<10x128xf32> to vector<1x128xf32>
    %192 = vector.broadcast %191 : vector<1x128xf32> to vector<10x128xf32>
    %193 = arith.mulf %27, %192 : vector<10x128xf32>
    %194 = vector.extract_strided_slice %163 {offsets = [9, 0], sizes = [1, 128], strides = [1, 1]} : vector<10x128xf32> to vector<1x128xf32>
    %195 = vector.broadcast %194 : vector<1x128xf32> to vector<10x128xf32>
    %196 = arith.mulf %30, %195 : vector<10x128xf32>
    %197 = arith.addf %166, %169 : vector<10x128xf32>
    %198 = arith.addf %172, %175 : vector<10x128xf32>
    %199 = arith.addf %178, %181 : vector<10x128xf32>
    %200 = arith.addf %184, %187 : vector<10x128xf32>
    %201 = arith.addf %190, %193 : vector<10x128xf32>
    %202 = arith.addf %197, %198 : vector<10x128xf32>
    %203 = arith.addf %199, %200 : vector<10x128xf32>
    %204 = arith.addf %201, %196 : vector<10x128xf32>
    %205 = arith.addf %202, %203 : vector<10x128xf32>
    %206 = arith.addf %205, %204 : vector<10x128xf32>
    %207 = math.tanh %206 : vector<10x128xf32>
    %208 = arith.addf %164, %207 : vector<10x128xf32>
    %c4 = arith.constant 4 : index
    %c0_11 = arith.constant 0 : index
    %c0_12 = arith.constant 0 : index
    %209 = vector.load %arg1[%c4, %c0_11, %c0_12] : memref<8x10x128xf32, #tpu.memory_space<vmem>>, vector<1x10x128xf32>
    %210 = vector.shape_cast %209 : vector<1x10x128xf32> to vector<10x128xf32>
    %211 = vector.extract_strided_slice %207 {offsets = [0, 0], sizes = [1, 128], strides = [1, 1]} : vector<10x128xf32> to vector<1x128xf32>
    %212 = vector.broadcast %211 : vector<1x128xf32> to vector<10x128xf32>
    %213 = arith.mulf %3, %212 : vector<10x128xf32>
    %214 = vector.extract_strided_slice %207 {offsets = [1, 0], sizes = [1, 128], strides = [1, 1]} : vector<10x128xf32> to vector<1x128xf32>
    %215 = vector.broadcast %214 : vector<1x128xf32> to vector<10x128xf32>
    %216 = arith.mulf %6, %215 : vector<10x128xf32>
    %217 = vector.extract_strided_slice %207 {offsets = [2, 0], sizes = [1, 128], strides = [1, 1]} : vector<10x128xf32> to vector<1x128xf32>
    %218 = vector.broadcast %217 : vector<1x128xf32> to vector<10x128xf32>
    %219 = arith.mulf %9, %218 : vector<10x128xf32>
    %220 = vector.extract_strided_slice %207 {offsets = [3, 0], sizes = [1, 128], strides = [1, 1]} : vector<10x128xf32> to vector<1x128xf32>
    %221 = vector.broadcast %220 : vector<1x128xf32> to vector<10x128xf32>
    %222 = arith.mulf %12, %221 : vector<10x128xf32>
    %223 = vector.extract_strided_slice %207 {offsets = [4, 0], sizes = [1, 128], strides = [1, 1]} : vector<10x128xf32> to vector<1x128xf32>
    %224 = vector.broadcast %223 : vector<1x128xf32> to vector<10x128xf32>
    %225 = arith.mulf %15, %224 : vector<10x128xf32>
    %226 = vector.extract_strided_slice %207 {offsets = [5, 0], sizes = [1, 128], strides = [1, 1]} : vector<10x128xf32> to vector<1x128xf32>
    %227 = vector.broadcast %226 : vector<1x128xf32> to vector<10x128xf32>
    %228 = arith.mulf %18, %227 : vector<10x128xf32>
    %229 = vector.extract_strided_slice %207 {offsets = [6, 0], sizes = [1, 128], strides = [1, 1]} : vector<10x128xf32> to vector<1x128xf32>
    %230 = vector.broadcast %229 : vector<1x128xf32> to vector<10x128xf32>
    %231 = arith.mulf %21, %230 : vector<10x128xf32>
    %232 = vector.extract_strided_slice %207 {offsets = [7, 0], sizes = [1, 128], strides = [1, 1]} : vector<10x128xf32> to vector<1x128xf32>
    %233 = vector.broadcast %232 : vector<1x128xf32> to vector<10x128xf32>
    %234 = arith.mulf %24, %233 : vector<10x128xf32>
    %235 = vector.extract_strided_slice %207 {offsets = [8, 0], sizes = [1, 128], strides = [1, 1]} : vector<10x128xf32> to vector<1x128xf32>
    %236 = vector.broadcast %235 : vector<1x128xf32> to vector<10x128xf32>
    %237 = arith.mulf %27, %236 : vector<10x128xf32>
    %238 = vector.extract_strided_slice %207 {offsets = [9, 0], sizes = [1, 128], strides = [1, 1]} : vector<10x128xf32> to vector<1x128xf32>
    %239 = vector.broadcast %238 : vector<1x128xf32> to vector<10x128xf32>
    %240 = arith.mulf %30, %239 : vector<10x128xf32>
    %241 = arith.addf %210, %213 : vector<10x128xf32>
    %242 = arith.addf %216, %219 : vector<10x128xf32>
    %243 = arith.addf %222, %225 : vector<10x128xf32>
    %244 = arith.addf %228, %231 : vector<10x128xf32>
    %245 = arith.addf %234, %237 : vector<10x128xf32>
    %246 = arith.addf %241, %242 : vector<10x128xf32>
    %247 = arith.addf %243, %244 : vector<10x128xf32>
    %248 = arith.addf %245, %240 : vector<10x128xf32>
    %249 = arith.addf %246, %247 : vector<10x128xf32>
    %250 = arith.addf %249, %248 : vector<10x128xf32>
    %251 = math.tanh %250 : vector<10x128xf32>
    %252 = arith.addf %208, %251 : vector<10x128xf32>
    %c5 = arith.constant 5 : index
    %c0_13 = arith.constant 0 : index
    %c0_14 = arith.constant 0 : index
    %253 = vector.load %arg1[%c5, %c0_13, %c0_14] : memref<8x10x128xf32, #tpu.memory_space<vmem>>, vector<1x10x128xf32>
    %254 = vector.shape_cast %253 : vector<1x10x128xf32> to vector<10x128xf32>
    %255 = vector.extract_strided_slice %251 {offsets = [0, 0], sizes = [1, 128], strides = [1, 1]} : vector<10x128xf32> to vector<1x128xf32>
    %256 = vector.broadcast %255 : vector<1x128xf32> to vector<10x128xf32>
    %257 = arith.mulf %3, %256 : vector<10x128xf32>
    %258 = vector.extract_strided_slice %251 {offsets = [1, 0], sizes = [1, 128], strides = [1, 1]} : vector<10x128xf32> to vector<1x128xf32>
    %259 = vector.broadcast %258 : vector<1x128xf32> to vector<10x128xf32>
    %260 = arith.mulf %6, %259 : vector<10x128xf32>
    %261 = vector.extract_strided_slice %251 {offsets = [2, 0], sizes = [1, 128], strides = [1, 1]} : vector<10x128xf32> to vector<1x128xf32>
    %262 = vector.broadcast %261 : vector<1x128xf32> to vector<10x128xf32>
    %263 = arith.mulf %9, %262 : vector<10x128xf32>
    %264 = vector.extract_strided_slice %251 {offsets = [3, 0], sizes = [1, 128], strides = [1, 1]} : vector<10x128xf32> to vector<1x128xf32>
    %265 = vector.broadcast %264 : vector<1x128xf32> to vector<10x128xf32>
    %266 = arith.mulf %12, %265 : vector<10x128xf32>
    %267 = vector.extract_strided_slice %251 {offsets = [4, 0], sizes = [1, 128], strides = [1, 1]} : vector<10x128xf32> to vector<1x128xf32>
    %268 = vector.broadcast %267 : vector<1x128xf32> to vector<10x128xf32>
    %269 = arith.mulf %15, %268 : vector<10x128xf32>
    %270 = vector.extract_strided_slice %251 {offsets = [5, 0], sizes = [1, 128], strides = [1, 1]} : vector<10x128xf32> to vector<1x128xf32>
    %271 = vector.broadcast %270 : vector<1x128xf32> to vector<10x128xf32>
    %272 = arith.mulf %18, %271 : vector<10x128xf32>
    %273 = vector.extract_strided_slice %251 {offsets = [6, 0], sizes = [1, 128], strides = [1, 1]} : vector<10x128xf32> to vector<1x128xf32>
    %274 = vector.broadcast %273 : vector<1x128xf32> to vector<10x128xf32>
    %275 = arith.mulf %21, %274 : vector<10x128xf32>
    %276 = vector.extract_strided_slice %251 {offsets = [7, 0], sizes = [1, 128], strides = [1, 1]} : vector<10x128xf32> to vector<1x128xf32>
    %277 = vector.broadcast %276 : vector<1x128xf32> to vector<10x128xf32>
    %278 = arith.mulf %24, %277 : vector<10x128xf32>
    %279 = vector.extract_strided_slice %251 {offsets = [8, 0], sizes = [1, 128], strides = [1, 1]} : vector<10x128xf32> to vector<1x128xf32>
    %280 = vector.broadcast %279 : vector<1x128xf32> to vector<10x128xf32>
    %281 = arith.mulf %27, %280 : vector<10x128xf32>
    %282 = vector.extract_strided_slice %251 {offsets = [9, 0], sizes = [1, 128], strides = [1, 1]} : vector<10x128xf32> to vector<1x128xf32>
    %283 = vector.broadcast %282 : vector<1x128xf32> to vector<10x128xf32>
    %284 = arith.mulf %30, %283 : vector<10x128xf32>
    %285 = arith.addf %254, %257 : vector<10x128xf32>
    %286 = arith.addf %260, %263 : vector<10x128xf32>
    %287 = arith.addf %266, %269 : vector<10x128xf32>
    %288 = arith.addf %272, %275 : vector<10x128xf32>
    %289 = arith.addf %278, %281 : vector<10x128xf32>
    %290 = arith.addf %285, %286 : vector<10x128xf32>
    %291 = arith.addf %287, %288 : vector<10x128xf32>
    %292 = arith.addf %289, %284 : vector<10x128xf32>
    %293 = arith.addf %290, %291 : vector<10x128xf32>
    %294 = arith.addf %293, %292 : vector<10x128xf32>
    %295 = math.tanh %294 : vector<10x128xf32>
    %296 = arith.addf %252, %295 : vector<10x128xf32>
    %c6 = arith.constant 6 : index
    %c0_15 = arith.constant 0 : index
    %c0_16 = arith.constant 0 : index
    %297 = vector.load %arg1[%c6, %c0_15, %c0_16] : memref<8x10x128xf32, #tpu.memory_space<vmem>>, vector<1x10x128xf32>
    %298 = vector.shape_cast %297 : vector<1x10x128xf32> to vector<10x128xf32>
    %299 = vector.extract_strided_slice %295 {offsets = [0, 0], sizes = [1, 128], strides = [1, 1]} : vector<10x128xf32> to vector<1x128xf32>
    %300 = vector.broadcast %299 : vector<1x128xf32> to vector<10x128xf32>
    %301 = arith.mulf %3, %300 : vector<10x128xf32>
    %302 = vector.extract_strided_slice %295 {offsets = [1, 0], sizes = [1, 128], strides = [1, 1]} : vector<10x128xf32> to vector<1x128xf32>
    %303 = vector.broadcast %302 : vector<1x128xf32> to vector<10x128xf32>
    %304 = arith.mulf %6, %303 : vector<10x128xf32>
    %305 = vector.extract_strided_slice %295 {offsets = [2, 0], sizes = [1, 128], strides = [1, 1]} : vector<10x128xf32> to vector<1x128xf32>
    %306 = vector.broadcast %305 : vector<1x128xf32> to vector<10x128xf32>
    %307 = arith.mulf %9, %306 : vector<10x128xf32>
    %308 = vector.extract_strided_slice %295 {offsets = [3, 0], sizes = [1, 128], strides = [1, 1]} : vector<10x128xf32> to vector<1x128xf32>
    %309 = vector.broadcast %308 : vector<1x128xf32> to vector<10x128xf32>
    %310 = arith.mulf %12, %309 : vector<10x128xf32>
    %311 = vector.extract_strided_slice %295 {offsets = [4, 0], sizes = [1, 128], strides = [1, 1]} : vector<10x128xf32> to vector<1x128xf32>
    %312 = vector.broadcast %311 : vector<1x128xf32> to vector<10x128xf32>
    %313 = arith.mulf %15, %312 : vector<10x128xf32>
    %314 = vector.extract_strided_slice %295 {offsets = [5, 0], sizes = [1, 128], strides = [1, 1]} : vector<10x128xf32> to vector<1x128xf32>
    %315 = vector.broadcast %314 : vector<1x128xf32> to vector<10x128xf32>
    %316 = arith.mulf %18, %315 : vector<10x128xf32>
    %317 = vector.extract_strided_slice %295 {offsets = [6, 0], sizes = [1, 128], strides = [1, 1]} : vector<10x128xf32> to vector<1x128xf32>
    %318 = vector.broadcast %317 : vector<1x128xf32> to vector<10x128xf32>
    %319 = arith.mulf %21, %318 : vector<10x128xf32>
    %320 = vector.extract_strided_slice %295 {offsets = [7, 0], sizes = [1, 128], strides = [1, 1]} : vector<10x128xf32> to vector<1x128xf32>
    %321 = vector.broadcast %320 : vector<1x128xf32> to vector<10x128xf32>
    %322 = arith.mulf %24, %321 : vector<10x128xf32>
    %323 = vector.extract_strided_slice %295 {offsets = [8, 0], sizes = [1, 128], strides = [1, 1]} : vector<10x128xf32> to vector<1x128xf32>
    %324 = vector.broadcast %323 : vector<1x128xf32> to vector<10x128xf32>
    %325 = arith.mulf %27, %324 : vector<10x128xf32>
    %326 = vector.extract_strided_slice %295 {offsets = [9, 0], sizes = [1, 128], strides = [1, 1]} : vector<10x128xf32> to vector<1x128xf32>
    %327 = vector.broadcast %326 : vector<1x128xf32> to vector<10x128xf32>
    %328 = arith.mulf %30, %327 : vector<10x128xf32>
    %329 = arith.addf %298, %301 : vector<10x128xf32>
    %330 = arith.addf %304, %307 : vector<10x128xf32>
    %331 = arith.addf %310, %313 : vector<10x128xf32>
    %332 = arith.addf %316, %319 : vector<10x128xf32>
    %333 = arith.addf %322, %325 : vector<10x128xf32>
    %334 = arith.addf %329, %330 : vector<10x128xf32>
    %335 = arith.addf %331, %332 : vector<10x128xf32>
    %336 = arith.addf %333, %328 : vector<10x128xf32>
    %337 = arith.addf %334, %335 : vector<10x128xf32>
    %338 = arith.addf %337, %336 : vector<10x128xf32>
    %339 = math.tanh %338 : vector<10x128xf32>
    %340 = arith.addf %296, %339 : vector<10x128xf32>
    %c7 = arith.constant 7 : index
    %c0_17 = arith.constant 0 : index
    %c0_18 = arith.constant 0 : index
    %341 = vector.load %arg1[%c7, %c0_17, %c0_18] : memref<8x10x128xf32, #tpu.memory_space<vmem>>, vector<1x10x128xf32>
    %342 = vector.shape_cast %341 : vector<1x10x128xf32> to vector<10x128xf32>
    %343 = vector.extract_strided_slice %339 {offsets = [0, 0], sizes = [1, 128], strides = [1, 1]} : vector<10x128xf32> to vector<1x128xf32>
    %344 = vector.broadcast %343 : vector<1x128xf32> to vector<10x128xf32>
    %345 = arith.mulf %3, %344 : vector<10x128xf32>
    %346 = vector.extract_strided_slice %339 {offsets = [1, 0], sizes = [1, 128], strides = [1, 1]} : vector<10x128xf32> to vector<1x128xf32>
    %347 = vector.broadcast %346 : vector<1x128xf32> to vector<10x128xf32>
    %348 = arith.mulf %6, %347 : vector<10x128xf32>
    %349 = vector.extract_strided_slice %339 {offsets = [2, 0], sizes = [1, 128], strides = [1, 1]} : vector<10x128xf32> to vector<1x128xf32>
    %350 = vector.broadcast %349 : vector<1x128xf32> to vector<10x128xf32>
    %351 = arith.mulf %9, %350 : vector<10x128xf32>
    %352 = vector.extract_strided_slice %339 {offsets = [3, 0], sizes = [1, 128], strides = [1, 1]} : vector<10x128xf32> to vector<1x128xf32>
    %353 = vector.broadcast %352 : vector<1x128xf32> to vector<10x128xf32>
    %354 = arith.mulf %12, %353 : vector<10x128xf32>
    %355 = vector.extract_strided_slice %339 {offsets = [4, 0], sizes = [1, 128], strides = [1, 1]} : vector<10x128xf32> to vector<1x128xf32>
    %356 = vector.broadcast %355 : vector<1x128xf32> to vector<10x128xf32>
    %357 = arith.mulf %15, %356 : vector<10x128xf32>
    %358 = vector.extract_strided_slice %339 {offsets = [5, 0], sizes = [1, 128], strides = [1, 1]} : vector<10x128xf32> to vector<1x128xf32>
    %359 = vector.broadcast %358 : vector<1x128xf32> to vector<10x128xf32>
    %360 = arith.mulf %18, %359 : vector<10x128xf32>
    %361 = vector.extract_strided_slice %339 {offsets = [6, 0], sizes = [1, 128], strides = [1, 1]} : vector<10x128xf32> to vector<1x128xf32>
    %362 = vector.broadcast %361 : vector<1x128xf32> to vector<10x128xf32>
    %363 = arith.mulf %21, %362 : vector<10x128xf32>
    %364 = vector.extract_strided_slice %339 {offsets = [7, 0], sizes = [1, 128], strides = [1, 1]} : vector<10x128xf32> to vector<1x128xf32>
    %365 = vector.broadcast %364 : vector<1x128xf32> to vector<10x128xf32>
    %366 = arith.mulf %24, %365 : vector<10x128xf32>
    %367 = vector.extract_strided_slice %339 {offsets = [8, 0], sizes = [1, 128], strides = [1, 1]} : vector<10x128xf32> to vector<1x128xf32>
    %368 = vector.broadcast %367 : vector<1x128xf32> to vector<10x128xf32>
    %369 = arith.mulf %27, %368 : vector<10x128xf32>
    %370 = vector.extract_strided_slice %339 {offsets = [9, 0], sizes = [1, 128], strides = [1, 1]} : vector<10x128xf32> to vector<1x128xf32>
    %371 = vector.broadcast %370 : vector<1x128xf32> to vector<10x128xf32>
    %372 = arith.mulf %30, %371 : vector<10x128xf32>
    %373 = arith.addf %342, %345 : vector<10x128xf32>
    %374 = arith.addf %348, %351 : vector<10x128xf32>
    %375 = arith.addf %354, %357 : vector<10x128xf32>
    %376 = arith.addf %360, %363 : vector<10x128xf32>
    %377 = arith.addf %366, %369 : vector<10x128xf32>
    %378 = arith.addf %373, %374 : vector<10x128xf32>
    %379 = arith.addf %375, %376 : vector<10x128xf32>
    %380 = arith.addf %377, %372 : vector<10x128xf32>
    %381 = arith.addf %378, %379 : vector<10x128xf32>
    %382 = arith.addf %381, %380 : vector<10x128xf32>
    %383 = math.tanh %382 : vector<10x128xf32>
    %384 = arith.addf %340, %383 : vector<10x128xf32>
    %c0_19 = arith.constant 0 : index
    %c0_20 = arith.constant 0 : index
    %385 = vector.load %arg3[%c0_19, %c0_20] : memref<128x10xf32, #tpu.memory_space<vmem>>, vector<128x10xf32>
    %cst_21 = arith.constant dense<0.000000e+00> : vector<128x128xf32>
    %386 = tpu.matmul %385, %384, %cst_21 {dimension_numbers = #tpu.dot_dimension_numbers<[1], [0], [0], [1], [0, 0, 1, 1], [], []>} : vector<128x10xf32>, vector<10x128xf32>, vector<128x128xf32> -> vector<128x128xf32>
    %c0_22 = arith.constant 0 : index
    %c0_23 = arith.constant 0 : index
    %387 = vector.load %arg4[%c0_22, %c0_23] : memref<128x1xf32, #tpu.memory_space<vmem>>, vector<128x1xf32>
    %388 = vector.broadcast %387 : vector<128x1xf32> to vector<128x128xf32>
    %389 = arith.addf %386, %388 : vector<128x128xf32>
    %c0_24 = arith.constant 0 : index
    %c0_25 = arith.constant 0 : index
    %390 = vector.load %arg5[%c0_24, %c0_25] : memref<128x128xf32, #tpu.memory_space<vmem>>, vector<128x128xf32>
    tpu.vector_store %arg5[%c0_24, %c0_25], %389 {strides = array<i32>} : memref<128x128xf32, #tpu.memory_space<vmem>>, vector<128x128xf32>,
    return
  }
  func.func @transform_0(%arg0: i32) -> (i32, i32, i32) {
    %c0_i32 = arith.constant 0 : i32
    %c0_i32_0 = arith.constant 0 : i32
    %c0_i32_1 = arith.constant 0 : i32
    return %c0_i32, %c0_i32_0, %arg0 : i32, i32, i32
  }
  func.func @transform_1(%arg0: i32) -> (i32, i32) {
    %c0_i32 = arith.constant 0 : i32
    %c0_i32_0 = arith.constant 0 : i32
    %c0_i32_1 = arith.constant 0 : i32
    return %c0_i32, %c0_i32_0 : i32, i32
  }
  func.func @transform_2(%arg0: i32) -> (i32, i32) {
    %c0_i32 = arith.constant 0 : i32
    %c0_i32_0 = arith.constant 0 : i32
    %c0_i32_1 = arith.constant 0 : i32
    return %c0_i32, %c0_i32_0 : i32, i32
  }
  func.func @transform_3(%arg0: i32) -> (i32, i32) {
    %c0_i32 = arith.constant 0 : i32
    %c0_i32_0 = arith.constant 0 : i32
    %c0_i32_1 = arith.constant 0 : i32
    return %c0_i32, %c0_i32_0 : i32, i32
  }
  func.func @transform_4(%arg0: i32) -> (i32, i32) {
    %c0_i32 = arith.constant 0 : i32
    %c0_i32_0 = arith.constant 0 : i32
    return %c0_i32, %arg0 : i32, i32
  }
}

</mosaic_0001>

<bundles_post_ra>
// kernel: tpu_custom_call.1
= control target key start
LH: loop header
LB: loop body
LE: loop exit
PB: predicated region body
PF: predicated region fallthrough
CT: control target
= control target key end

     0   :  { %v1267_v1 = vmov 2   ;;  %v1268_v2 = vmov 0   ;;  %s1793_s0 = inlined_call_operand.vmem [shape: f32[8,10,128], index: 0, kind: input, shape index: {}]   ;;  %s1794_s1 = inlined_call_operand.vmem [shape: f32[10,10], index: 1, kind: input, shape index: {}]   ;;  %s1795_s2 = inlined_call_operand.vmem [shape: f32[128,10], index: 2, kind: input, shape index: {}]   ;;  %s1796_s3 = inlined_call_operand.vmem [shape: f32[128,1], index: 3, kind: input, shape index: {}]   ;;  %s1797_s4 = inlined_call_operand.hbm [shape: f32[128,128], index: 4, kind: output, shape index: {}]  }
   0x1   :  { %v18_v0 = vld [vmem:[%s1794_s1] sm:$0xff]  ;;  %1194 = vset.pattern.permute.xlu1 %v1267_v1  ;;  %1193 = vset.pattern.permute.xlu0 %v1268_v2 }
   0x2   :  { %39 = vperm.xlu1 %1194, %v18_v0   ;;  %22 = vperm.xlu0 %1193, %v18_v0  }
   0x3   :  { %9 = vsyncpa [#allocation3], 0  ;;  %v1269_v3 = vmov 3   ;;  %v1270_v4 = vmov 5   ;;  %v1271_v5 = vmov 4   ;;  %v1272_v6 = vmov 1  }
   0x4   :  { %v19_v7 = vld [vmem:[%s1794_s1 + $0x8] sm:$0x3]  ;;  %v1273_v8 = vmov 6   ;;  %v1274_v9 = vmov 7   ;;  %v1275_v10 = vmov 8   ;;  %v1276_v11 = vmov 9  }
   0x5   :  { %v102_v32 = vld [vmem:[%s1793_s0] sm:$0xff]  ;;  %v103_v54 = vld [vmem:[%s1793_s0 + $0x8] sm:$0x3]  ;;  %vm869_vm0 = vcmask 80896   ;;  %vm918_vm1 = vcmask 1041408  }
   0x6   :  { %1195 = vset.pattern.permute.xlu1 %v1269_v3  ;;  %1197 = vset.pattern.permute.xlu0 %v1270_v4 }
   0x7   :  { %47 = vperm.xlu1 %1195, %v18_v0   ;;  %63 = vperm.xlu0 %1197, %v18_v0  }
   0xb   :  { %1196 = vset.pattern.permute.xlu1 %v1271_v5  ;;  %1198 = vset.pattern.permute.xlu0 %v1272_v6 }
   0xc   :  { %55 = vperm.xlu1 %1196, %v18_v0   ;;  %31 = vperm.xlu0 %1198, %v18_v0  }
  0x10   :  { %1199 = vset.pattern.permute.xlu1 %v1273_v8  ;;  %35 = vperm.xlu0 %1198, %v19_v7  }
  0x11   :  { %71 = vperm.xlu1 %1199, %v18_v0  }
  0x14   :  { %1203 = vset.pattern.permute.xlu0 %v1271_v5 }
  0x15   :  { %1200 = vset.pattern.permute.xlu1 %v1268_v2  ;;  %59 = vperm.xlu0 %1203, %v19_v7  }
  0x16   :  { %27 = vperm.xlu1 %1200, %v19_v7  }
  0x19   :  { %1206 = vset.pattern.permute.xlu0 %v1274_v9 }
  0x1a   :  { %1201 = vset.pattern.permute.xlu1 %v1267_v1  ;;  %79 = vperm.xlu0 %1206, %v18_v0  }
  0x1b   :  { %43 = vperm.xlu1 %1201, %v19_v7  }
  0x1e   :  { %1209 = vset.pattern.permute.xlu0 %v1275_v10 }
  0x1f   :  { %1202 = vset.pattern.permute.xlu1 %v1269_v3  ;;  %91 = vperm.xlu0 %1209, %v19_v7  }
  0x20   :  { %51 = vperm.xlu1 %1202, %v19_v7  }
  0x23   :  { %1211 = vset.pattern.permute.xlu0 %v1268_v2 }
  0x24   :  { %1204 = vset.pattern.permute.xlu1 %v1270_v4 }
  0x25   :  { %67 = vperm.xlu1 %1204, %v19_v7  }
  0x29   :  { %1205 = vset.pattern.permute.xlu1 %v1273_v8 }
  0x2a   :  { %75 = vperm.xlu1 %1205, %v19_v7  }
  0x2e   :  { %1207 = vset.pattern.permute.xlu1 %v1275_v10 }
  0x2f   :  { %87 = vperm.xlu1 %1207, %v18_v0  }
  0x33   :  { %1208 = vset.pattern.permute.xlu1 %v1274_v9  ;;  %v151_v9 = vlaneseq }
  0x34   :  { %83 = vperm.xlu1 %1208, %v19_v7  }
  0x38   :  { %1210 = vset.pattern.permute.xlu1 %v1276_v11  ;;  %v152_v11 = vshrl.u32 %v151_v9, 7 }
  0x39   :  { %95 = vperm.xlu1 %1210, %v18_v0  }
  0x3d   :  { %99 = vperm.xlu1 %1210, %v19_v7  }
  0x41   :  { %1212 = vset.pattern.permute.xlu1 %v1268_v2 }
  0x7d   :  { %v1311_v12 = vpop.permute.xlu1 %39  ;;  %v1319_v16 = vpop.permute.xlu0 %22 }
  0x7e   :  { %v104_v27 = vmul.f32 0.0, %v1319_v16  ;;  %v108_v35 = vmul.f32 0.0, %v1311_v12 }
  0x80   :  { %v124_v36 = vadd.f32 %v104_v27, %v102_v32  ;;  %v1377_v27 = vsub.s32 0, %v152_v11  ;;  %v1385_v32 = vsub.s32 4, %v152_v11 }
  0x82   :  { %v1313_v13 = vpop.permute.xlu1 %47  ;;  %v1325_v19 = vpop.permute.xlu0 %63 }
  0x83   :  { %v114_v28 = vmul.f32 0.0, %v1325_v19  ;;  %v110_v34 = vmul.f32 0.0, %v1313_v13 }
  0x87   :  { %v1315_v14 = vpop.permute.xlu1 %55  ;;  %v1329_v21 = vpop.permute.xlu0 %31 }
  0x88   :  { %v112_v29 = vmul.f32 0.0, %v1315_v14  ;;  %v106_v33 = vmul.f32 0.0, %v1329_v21 }
  0x8a   :  { %v128_v37 = vadd.f32 %v112_v29, %v110_v34  ;;  %v126_v41 = vadd.f32 %v108_v35, %v106_v33  ;;  %v1381_v29 = vsub.s32 2, %v152_v11  ;;  %v1387_v33 = vsub.s32 5, %v152_v11 }
  0x8b   :  { %v1333_v23 = vpop.permute.xlu0 %35  ;;  %v1389_v34 = vsub.s32 6, %v152_v11 }
  0x8c   :  { %v1317_v15 = vpop.permute.xlu1 %71  ;;  %v107_v43 = vmul.f32 0.0, %v1333_v23  ;;  %v134_v53 = vadd.f32 %v126_v41, %v124_v36  ;;  %v1393_v36 = vsub.s32 7, %v152_v11 }
  0x8d   :  { %1811 = vst [vmem:[#allocation5_spill] sm:$0xff] %v1317_v15  ;;  %v116_v30 = vmul.f32 0.0, %v1317_v15 }
  0x8f   :  { %v130_v38 = vadd.f32 %v116_v30, %v114_v28  ;;  %v1379_v28 = vsub.s32 1, %v152_v11  ;;  %v1383_v30 = vsub.s32 3, %v152_v11 }
  0x90   :  { %v1337_v25 = vpop.permute.xlu0 %59 }
  0x91   :  { %v1321_v17 = vpop.permute.xlu1 %27  ;;  %v113_v44 = vmul.f32 0.0, %v1337_v25  ;;  %v136_v50 = vadd.f32 %v130_v38, %v128_v37 }
  0x92   :  { %v105_v51 = vmul.f32 0.0, %v1321_v17 }
  0x93   :  { %v140_v1 = vadd.f32 %v136_v50, %v134_v53 }
  0x94   :  { %v125_v62 = vadd.f32 %v105_v51, %v103_v54  ;;  %v1099_v51 = vld [vmem:[%s1793_s0 + $0x10] sm:$0xff] }
  0x95   :  { %v1345_v31 = vpop.permute.xlu0 %79 }
  0x96   :  { %v1323_v18 = vpop.permute.xlu1 %43  ;;  %1814 = vst [vmem:[#allocation8_spill] sm:$0xff] %v1345_v31  ;;  %v118_v48 = vmul.f32 0.0, %v1345_v31 }
  0x97   :  { %v109_v42 = vmul.f32 0.0, %v1323_v18 }
  0x99   :  { %v127_v55 = vadd.f32 %v109_v42, %v107_v43 }
  0x9a   :  { %v1363_v49 = vpop.permute.xlu0 %91 }
  0x9b   :  { %v1327_v20 = vpop.permute.xlu1 %51  ;;  %v121_v56 = vmul.f32 0.0, %v1363_v49  ;;  %v135_v3 = vadd.f32 %v127_v55, %v125_v62 }
  0x9c   :  { %v111_v45 = vmul.f32 0.0, %v1327_v20 }
  0x9e   :  { %v129_v58 = vadd.f32 %v113_v44, %v111_v45 }
  0xa0   :  { %v1331_v22 = vpop.permute.xlu1 %67 }
  0xa1   :  { %1812 = vst [vmem:[#allocation6_spill] sm:$0xff] %v1331_v22  ;;  %v115_v46 = vmul.f32 0.0, %v1331_v22 }
  0xa5   :  { %v1335_v24 = vpop.permute.xlu1 %75 }
  0xa6   :  { %1813 = vst [vmem:[#allocation7_spill] sm:$0xff] %v1335_v24  ;;  %v117_v39 = vmul.f32 0.0, %v1335_v24 }
  0xa8   :  { %v131_v52 = vadd.f32 %v117_v39, %v115_v46 }
  0xaa   :  { %v1339_v26 = vpop.permute.xlu1 %87  ;;  %v137_v63 = vadd.f32 %v131_v52, %v129_v58  ;;  %v1100_v52 = vld [vmem:[%s1793_s0 + $0x18] sm:$0x3] }
  0xab   :  { %v120_v47 = vmul.f32 0.0, %v1339_v26 }
  0xac   :  { %v141_v8 = vadd.f32 %v137_v63, %v135_v3 }
  0xad   :  { %v132_v59 = vadd.f32 %v120_v47, %v118_v48 }
  0xaf   :  { %v1354_v40 = vpop.permute.xlu1 %83 }
  0xb0   :  { %1815 = vst [vmem:[#allocation9_spill] sm:$0xff] %v1354_v40  ;;  %v119_v60 = vmul.f32 0.0, %v1354_v40 }
  0xb2   :  { %v133_v4 = vadd.f32 %v121_v56, %v119_v60 }
  0xb4   :  { %v1370_v57 = vpop.permute.xlu1 %95 }
  0xb5   :  { %v122_v61 = vmul.f32 0.0, %v1370_v57 }
  0xb7   :  { %v138_v0 = vadd.f32 %v132_v59, %v122_v61 }
  0xb8   :  { %v1374_v2 = vpop.permute.xlu1 %99 }
  0xb9   :  { %v142_v5 = vadd.f32 %v140_v1, %v138_v0  ;;  %v123_v6 = vmul.f32 0.0, %v1374_v2 }
  0xbb   :  { %1213 = vtanh.f32 %v142_v5  ;;  %v139_v7 = vadd.f32 %v133_v4, %v123_v6 }
  0xbd   :  { %v143_v10 = vadd.f32 %v141_v8, %v139_v7 }
  0xbf   :  { %1215 = vtanh.f32 %v143_v10 }
  0xc8   :  { %v1391_v35 = vpop.eup %1213 }
  0xc9   :  { %v154_v37 = vrot.slane %v1391_v35, %v1377_v27  ;;  %v160_v38 = vrot.slane %v1391_v35, %v1379_v28  ;;  %v166_v39 = vrot.slane %v1391_v35, %v1381_v29  ;;  %v172_v41 = vrot.slane %v1391_v35, %v1383_v30 }
  0xca   :  { %v178_v42 = vrot.slane %v1391_v35, %v1385_v32  ;;  %v184_v43 = vrot.slane %v1391_v35, %v1387_v33  ;;  %v190_v44 = vrot.slane %v1391_v35, %v1389_v34  ;;  %v196_v60 = vrot.slane %v1391_v35, %v1393_v36 }
  0xcb   :  { %v155_v45 = vmul.f32 %v154_v37, %v1319_v16  ;;  %v156_v46 = vmul.f32 %v154_v37, %v1321_v17  ;;  %v161_v47 = vmul.f32 %v160_v38, %v1329_v21  ;;  %v162_v48 = vmul.f32 %v160_v38, %v1333_v23 }
  0xcc   :  { %v1413_v50 = vpop.eup %1215  ;;  %v167_v53 = vmul.f32 %v166_v39, %v1311_v12  ;;  %v168_v54 = vmul.f32 %v166_v39, %v1323_v18  ;;  %v173_v55 = vmul.f32 %v172_v41, %v1313_v13  ;;  %v174_v56 = vmul.f32 %v172_v41, %v1327_v20 }
  0xcd   :  { %v179_v58 = vmul.f32 %v178_v42, %v1315_v14  ;;  %v180_v59 = vmul.f32 %v178_v42, %v1337_v25  ;;  %v185_v61 = vmul.f32 %v184_v43, %v1325_v19  ;;  %v186_v62 = vmul.f32 %v184_v43, %v1331_v22 }
  0xce   :  { %v191_v63 = vmul.f32 %v190_v44, %v1317_v15  ;;  %v192_v0 = vmul.f32 %v190_v44, %v1335_v24  ;;  %v202_v1 = vrot.slane %v1413_v50, %v1377_v27  ;;  %v208_v3 = vrot.slane %v1413_v50, %v1379_v28 }
  0xcf   :  { %v211_v4 = vadd.f32 %v1099_v51, %v155_v45  ;;  %v212_v5 = vadd.f32 %v1100_v52, %v156_v46  ;;  %v213_v6 = vadd.f32 %v167_v53, %v161_v47  ;;  %v214_v7 = vadd.f32 %v168_v54, %v162_v48 }
  0xd0   :  { %v215_v8 = vadd.f32 %v179_v58, %v173_v55  ;;  %v216_v9 = vadd.f32 %v180_v59, %v174_v56  ;;  %v197_v10 = vmul.f32 %v196_v60, %v1345_v31  ;;  %v198_v11 = vmul.f32 %v196_v60, %v1354_v40 }
  0xd1   :  { %v203_v37 = vmul.f32 %v202_v1, %v1339_v26  ;;  %v204_v38 = vmul.f32 %v202_v1, %v1363_v49  ;;  %v217_v39 = vadd.f32 %v191_v63, %v185_v61  ;;  %v218_v41 = vadd.f32 %v192_v0, %v186_v62 }
  0xd2   :  { %v221_v42 = vadd.f32 %v213_v6, %v211_v4  ;;  %v209_v43 = vmul.f32 %v208_v3, %v1370_v57  ;;  %v210_v46 = vmul.f32 %v208_v3, %v1374_v2  ;;  %v222_v47 = vadd.f32 %v214_v7, %v212_v5 }
  0xd3   :  { %v219_v44 = vadd.f32 %v203_v37, %v197_v10  ;;  %v220_v45 = vadd.f32 %v204_v38, %v198_v11  ;;  %v223_v48 = vadd.f32 %v217_v39, %v215_v8  ;;  %v224_v51 = vadd.f32 %v218_v41, %v216_v9  ;;  %v1101_v10 = vld [vmem:[%s1793_s0 + $0x20] sm:$0xff]  ;;  %v1102_v11 = vld [vmem:[%s1793_s0 + $0x28] sm:$0x3] }
  0xd5   :  { %v225_v52 = vadd.f32 %v219_v44, %v209_v43  ;;  %v226_v53 = vadd.f32 %v220_v45, %v210_v46  ;;  %v227_v54 = vadd.f32 %v223_v48, %v221_v42  ;;  %v228_v55 = vadd.f32 %v224_v51, %v222_v47 }
  0xd7   :  { %v229_v56 = vadd.f32 %v227_v54, %v225_v52  ;;  %v230_v58 = vadd.f32 %v228_v55, %v226_v53 }
  0xd9   :  { %1217 = vtanh.f32 %v229_v56 }
  0xda   :  { %1219 = vtanh.f32 %v230_v58 }
  0xe6   :  { %v1218_v59 = vpop.eup %1217 }
  0xe7   :  { %v241_v60 = vrot.slane %v1218_v59, %v1377_v27  ;;  %v247_v61 = vrot.slane %v1218_v59, %v1379_v28  ;;  %v253_v62 = vrot.slane %v1218_v59, %v1381_v29  ;;  %v259_v63 = vrot.slane %v1218_v59, %v1383_v30  ;;  %v1220_v9 = vpop.eup %1219 }
  0xe8   :  { %v265_v0 = vrot.slane %v1218_v59, %v1385_v32  ;;  %v271_v1 = vrot.slane %v1218_v59, %v1387_v33  ;;  %v277_v3 = vrot.slane %v1218_v59, %v1389_v34  ;;  %v283_v4 = vrot.slane %v1218_v59, %v1393_v36 }
  0xe9   :  { %v242_v5 = vmul.f32 %v241_v60, %v1319_v16  ;;  %v243_v6 = vmul.f32 %v241_v60, %v1321_v17  ;;  %v248_v7 = vmul.f32 %v247_v61, %v1329_v21  ;;  %v249_v8 = vmul.f32 %v247_v61, %v1333_v23 }
  0xea   :  { %v254_v37 = vmul.f32 %v253_v62, %v1311_v12  ;;  %v255_v38 = vmul.f32 %v253_v62, %v1323_v18  ;;  %v260_v39 = vmul.f32 %v259_v63, %v1313_v13  ;;  %v261_v41 = vmul.f32 %v259_v63, %v1327_v20 }
  0xeb   :  { %v266_v42 = vmul.f32 %v265_v0, %v1315_v14  ;;  %v267_v43 = vmul.f32 %v265_v0, %v1337_v25  ;;  %v272_v44 = vmul.f32 %v271_v1, %v1325_v19  ;;  %v273_v45 = vmul.f32 %v271_v1, %v1331_v22 }
  0xec   :  { %v278_v46 = vmul.f32 %v277_v3, %v1317_v15  ;;  %v279_v47 = vmul.f32 %v277_v3, %v1335_v24  ;;  %v284_v48 = vmul.f32 %v283_v4, %v1345_v31  ;;  %v285_v51 = vmul.f32 %v283_v4, %v1354_v40 }
  0xed   :  { %v289_v52 = vrot.slane %v1220_v9, %v1377_v27  ;;  %v295_v53 = vrot.slane %v1220_v9, %v1379_v28  ;;  %v298_v54 = vadd.f32 %v1101_v10, %v242_v5  ;;  %v299_v55 = vadd.f32 %v1102_v11, %v243_v6 }
  0xee   :  { %v300_v56 = vadd.f32 %v254_v37, %v248_v7  ;;  %v301_v58 = vadd.f32 %v255_v38, %v249_v8  ;;  %v302_v60 = vadd.f32 %v266_v42, %v260_v39  ;;  %v303_v61 = vadd.f32 %v267_v43, %v261_v41 }
  0xef   :  { %v290_v62 = vmul.f32 %v289_v52, %v1339_v26  ;;  %v291_v63 = vmul.f32 %v289_v52, %v1363_v49  ;;  %v304_v0 = vadd.f32 %v278_v46, %v272_v44  ;;  %v305_v1 = vadd.f32 %v279_v47, %v273_v45 }
  0xf0   :  { %v308_v3 = vadd.f32 %v300_v56, %v298_v54  ;;  %v309_v31 = vadd.f32 %v301_v58, %v299_v55  ;;  %v234_v4 = vadd.f32 %v1220_v9, %v1413_v50  ;;  %v233_v40 = vadd.f32 %v1218_v59, %v1391_v35  ;;  %v1104_v54 = vld [vmem:[%s1793_s0 + $0x38] sm:$0x3] }
  0xf1   :  { %v306_v24 = vadd.f32 %v290_v62, %v284_v48  ;;  %v296_v5 = vmul.f32 %v295_v53, %v1370_v57  ;;  %v307_v6 = vadd.f32 %v291_v63, %v285_v51  ;;  %v310_v7 = vadd.f32 %v304_v0, %v302_v60 }
  0xf2   :  { %v311_v8 = vadd.f32 %v305_v1, %v303_v61  ;;  %v297_v10 = vmul.f32 %v295_v53, %v1374_v2  ;;  %v1103_v53 = vld [vmem:[%s1793_s0 + $0x30] sm:$0xff] }
  0xf3   :  { %v312_v11 = vadd.f32 %v306_v24, %v296_v5  ;;  %v314_v37 = vadd.f32 %v310_v7, %v308_v3  ;;  %v1816_v3 = vld [vmem:[#allocation7_spill] sm:$0xff] }
  0xf4   :  { %v315_v38 = vadd.f32 %v311_v8, %v309_v31  ;;  %v313_v39 = vadd.f32 %v307_v6, %v297_v10  ;;  %v1817_v6 = vld [vmem:[#allocation8_spill] sm:$0xff]  ;;  %v1818_v8 = vld [vmem:[#allocation9_spill] sm:$0xff] }
  0xf5   :  { %v316_v41 = vadd.f32 %v314_v37, %v312_v11 }
  0xf6   :  { %v317_v42 = vadd.f32 %v315_v38, %v313_v39 }
  0xf7   :  { %1221 = vtanh.f32 %v316_v41 }
  0xf8   :  { %1223 = vtanh.f32 %v317_v42 }
 0x104   :  { %v1222_v43 = vpop.eup %1221 }
 0x105   :  { %v328_v50 = vrot.slane %v1222_v43, %v1377_v27  ;;  %v334_v35 = vrot.slane %v1222_v43, %v1379_v28  ;;  %v340_v59 = vrot.slane %v1222_v43, %v1381_v29  ;;  %v346_v9 = vrot.slane %v1222_v43, %v1383_v30  ;;  %v1224_v52 = vpop.eup %1223 }
 0x106   :  { %v352_v44 = vrot.slane %v1222_v43, %v1385_v32  ;;  %v358_v24 = vrot.slane %v1222_v43, %v1387_v33  ;;  %v364_v31 = vrot.slane %v1222_v43, %v1389_v34  ;;  %v370_v45 = vrot.slane %v1222_v43, %v1393_v36 }
 0x107   :  { %v329_v46 = vmul.f32 %v328_v50, %v1319_v16  ;;  %v330_v47 = vmul.f32 %v328_v50, %v1321_v17  ;;  %v335_v48 = vmul.f32 %v334_v35, %v1329_v21  ;;  %v336_v51 = vmul.f32 %v334_v35, %v1333_v23 }
 0x108   :  { %v341_v55 = vmul.f32 %v340_v59, %v1311_v12  ;;  %v342_v56 = vmul.f32 %v340_v59, %v1323_v18  ;;  %v347_v58 = vmul.f32 %v346_v9, %v1313_v13  ;;  %v348_v60 = vmul.f32 %v346_v9, %v1327_v20 }
 0x109   :  { %v353_v61 = vmul.f32 %v352_v44, %v1315_v14  ;;  %v354_v62 = vmul.f32 %v352_v44, %v1337_v25  ;;  %v359_v63 = vmul.f32 %v358_v24, %v1325_v19  ;;  %v360_v0 = vmul.f32 %v358_v24, %v1331_v22 }
 0x10a   :  { %v365_v1 = vmul.f32 %v364_v31, %v1317_v15  ;;  %v366_v5 = vmul.f32 %v364_v31, %v1816_v3  ;;  %v371_v7 = vmul.f32 %v370_v45, %v1817_v6  ;;  %v372_v10 = vmul.f32 %v370_v45, %v1818_v8 }
 0x10b   :  { %v376_v11 = vrot.slane %v1224_v52, %v1377_v27  ;;  %v382_v37 = vrot.slane %v1224_v52, %v1379_v28  ;;  %v385_v38 = vadd.f32 %v1103_v53, %v329_v46  ;;  %v386_v39 = vadd.f32 %v1104_v54, %v330_v47 }
 0x10c   :  { %v387_v41 = vadd.f32 %v341_v55, %v335_v48  ;;  %v388_v42 = vadd.f32 %v342_v56, %v336_v51  ;;  %v389_v50 = vadd.f32 %v353_v61, %v347_v58  ;;  %v390_v35 = vadd.f32 %v354_v62, %v348_v60 }
 0x10d   :  { %v377_v59 = vmul.f32 %v376_v11, %v1339_v26  ;;  %v378_v9 = vmul.f32 %v376_v11, %v1363_v49  ;;  %v391_v44 = vadd.f32 %v365_v1, %v359_v63  ;;  %v392_v24 = vadd.f32 %v366_v5, %v360_v0 }
 0x10e   :  { %v395_v31 = vadd.f32 %v387_v41, %v385_v38  ;;  %v396_v6 = vadd.f32 %v388_v42, %v386_v39  ;;  %v321_v45 = vadd.f32 %v1224_v52, %v234_v4  ;;  %v320_v8 = vadd.f32 %v1222_v43, %v233_v40 }
 0x10f   :  { %v393_v3 = vadd.f32 %v377_v59, %v371_v7  ;;  %v383_v15 = vmul.f32 %v382_v37, %v1370_v57  ;;  %v394_v22 = vadd.f32 %v378_v9, %v372_v10  ;;  %v397_v46 = vadd.f32 %v391_v44, %v389_v50  ;;  %v1106_v7 = vld [vmem:[%s1793_s0 + $0x48] sm:$0x3]  ;;  %v1820_v59 = vld [vmem:[#allocation5_spill] sm:$0xff]  ;;  %v1821_v44 = vld [vmem:[#allocation7_spill] sm:$0xff] }
 0x110   :  { %v398_v47 = vadd.f32 %v392_v24, %v390_v35  ;;  %v384_v48 = vmul.f32 %v382_v37, %v1374_v2  ;;  %v1819_v50 = vld [vmem:[#allocation6_spill] sm:$0xff] }
 0x111   :  { %v399_v51 = vadd.f32 %v393_v3, %v383_v15  ;;  %v401_v53 = vadd.f32 %v397_v46, %v395_v31  ;;  %v1822_v31 = vld [vmem:[#allocation8_spill] sm:$0xff] }
 0x112   :  { %v402_v54 = vadd.f32 %v398_v47, %v396_v6  ;;  %v400_v55 = vadd.f32 %v394_v22, %v384_v48  ;;  %v1105_v6 = vld [vmem:[%s1793_s0 + $0x40] sm:$0xff] }
 0x113   :  { %v403_v56 = vadd.f32 %v401_v53, %v399_v51  ;;  %v1823_v47 = vld [vmem:[#allocation9_spill] sm:$0xff] }
 0x114   :  { %v404_v58 = vadd.f32 %v402_v54, %v400_v55 }
 0x115   :  { %1225 = vtanh.f32 %v403_v56 }
 0x116   :  { %1227 = vtanh.f32 %v404_v58 }
 0x122   :  { %v1226_v60 = vpop.eup %1225 }
 0x123   :  { %v415_v61 = vrot.slane %v1226_v60, %v1377_v27  ;;  %v421_v40 = vrot.slane %v1226_v60, %v1379_v28  ;;  %v427_v4 = vrot.slane %v1226_v60, %v1381_v29  ;;  %v433_v43 = vrot.slane %v1226_v60, %v1383_v30  ;;  %v1228_v5 = vpop.eup %1227 }
 0x124   :  { %v439_v52 = vrot.slane %v1226_v60, %v1385_v32  ;;  %v445_v15 = vrot.slane %v1226_v60, %v1387_v33  ;;  %v451_v62 = vrot.slane %v1226_v60, %v1389_v34  ;;  %v457_v22 = vrot.slane %v1226_v60, %v1393_v36 }
 0x125   :  { %v416_v63 = vmul.f32 %v415_v61, %v1319_v16  ;;  %v417_v0 = vmul.f32 %v415_v61, %v1321_v17  ;;  %v422_v1 = vmul.f32 %v421_v40, %v1329_v21  ;;  %v423_v3 = vmul.f32 %v421_v40, %v1333_v23 }
 0x126   :  { %v428_v10 = vmul.f32 %v427_v4, %v1311_v12  ;;  %v429_v11 = vmul.f32 %v427_v4, %v1323_v18  ;;  %v434_v37 = vmul.f32 %v433_v43, %v1313_v13  ;;  %v435_v38 = vmul.f32 %v433_v43, %v1327_v20 }
 0x127   :  { %v440_v39 = vmul.f32 %v439_v52, %v1315_v14  ;;  %v441_v41 = vmul.f32 %v439_v52, %v1337_v25  ;;  %v446_v42 = vmul.f32 %v445_v15, %v1325_v19  ;;  %v447_v35 = vmul.f32 %v445_v15, %v1819_v50 }
 0x128   :  { %v452_v9 = vmul.f32 %v451_v62, %v1820_v59  ;;  %v453_v24 = vmul.f32 %v451_v62, %v1821_v44  ;;  %v458_v46 = vmul.f32 %v457_v22, %v1822_v31  ;;  %v459_v48 = vmul.f32 %v457_v22, %v1823_v47  ;;  %v757_v22 = vld [vmem:[%s1795_s2] sm:$0xff] }
 0x129   :  { %v463_v51 = vrot.slane %v1228_v5, %v1377_v27  ;;  %v469_v53 = vrot.slane %v1228_v5, %v1379_v28  ;;  %v472_v54 = vadd.f32 %v1105_v6, %v416_v63  ;;  %v473_v55 = vadd.f32 %v1106_v7, %v417_v0  ;;  %v765_v63 = vld [vmem:[%s1795_s2 + $0x40] sm:$0xff]  ;;  %1152 = vmatprep.mubr.msk.f32.mxu0 %vm869_vm0, %v757_v22 }
 0x12a   :  { %v474_v56 = vadd.f32 %v428_v10, %v422_v1  ;;  %v475_v58 = vadd.f32 %v429_v11, %v423_v3  ;;  %v476_v61 = vadd.f32 %v440_v39, %v434_v37  ;;  %v477_v40 = vadd.f32 %v441_v41, %v435_v38  ;;  %1164 = vmatprep.mubr.msk.f32.mxu1 %vm869_vm0, %v765_v63 }
 0x12b   :  { %v464_v4 = vmul.f32 %v463_v51, %v1339_v26  ;;  %v465_v43 = vmul.f32 %v463_v51, %v1363_v49  ;;  %v478_v52 = vadd.f32 %v452_v9, %v446_v42  ;;  %v479_v15 = vadd.f32 %v453_v24, %v447_v35  ;;  %v775_v42 = vld [vmem:[%s1796_s3 + $0x10] sm:$0xff]  ;;  %v776_v35 = vld [vmem:[%s1796_s3 + $0x18] sm:$0xff]  ;;  %v777_v24 = vld [vmem:[%s1796_s3 + $0x20] sm:$0xff] }
 0x12c   :  { %v482_v62 = vadd.f32 %v474_v56, %v472_v54  ;;  %v483_v31 = vadd.f32 %v475_v58, %v473_v55  ;;  %v470_v0 = vmul.f32 %v469_v53, %v1370_v57  ;;  %v1558_v3 = vadd.f32 %v1228_v5, %v321_v45  ;;  %v774_v45 = vld [vmem:[%s1796_s3 + $0x8] sm:$0xff]  ;;  %v781_v51 = vld [vmem:[%s1796_s3 + $0x40] sm:$0xff] }
 0x12d   :  { %v480_v1 = vadd.f32 %v464_v4, %v458_v46  ;;  %v1560_v6 = vadd.f32 %v1226_v60, %v320_v8  ;;  %v481_v7 = vadd.f32 %v465_v43, %v459_v48  ;;  %v484_v10 = vadd.f32 %v478_v52, %v476_v61  ;;  %v773_v8 = vld [vmem:[%s1796_s3] sm:$0xff]  ;;  %796 = vperm.xlu1 %1212, %v774_v45   ;;  %v779_v46 = vld [vmem:[%s1796_s3 + $0x30] sm:$0xff]  ;;  %v780_v48 = vld [vmem:[%s1796_s3 + $0x38] sm:$0xff] }
 0x12e   :  { %v485_v11 = vadd.f32 %v479_v15, %v477_v40  ;;  %v471_v37 = vmul.f32 %v469_v53, %v1374_v2  ;;  %791 = vperm.xlu0 %1211, %v773_v8   ;;  %v782_v53 = vld [vmem:[%s1796_s3 + $0x48] sm:$0xff]  ;;  %v783_v15 = vld [vmem:[%s1796_s3 + $0x50] sm:$0xff] }
 0x12f   :  { %v486_v38 = vadd.f32 %v480_v1, %v470_v0  ;;  %v488_v39 = vadd.f32 %v484_v10, %v482_v62  ;;  %v784_v1 = vld [vmem:[%s1796_s3 + $0x58] sm:$0xff]  ;;  %v1107_v10 = vld [vmem:[%s1793_s0 + $0x50] sm:$0xff] }
 0x130   :  { %v489_v41 = vadd.f32 %v485_v11, %v483_v31  ;;  %v487_v60 = vadd.f32 %v481_v7, %v471_v37  ;;  %v778_v31 = vld [vmem:[%s1796_s3 + $0x28] sm:$0xff]  ;;  %v1108_v11 = vld [vmem:[%s1793_s0 + $0x58] sm:$0x3] }
 0x131   :  { %v490_v5 = vadd.f32 %v488_v39, %v486_v38  ;;  %801 = vperm.xlu1 %1212, %v775_v42  }
 0x132   :  { %v491_v9 = vadd.f32 %v489_v41, %v487_v60  ;;  %806 = vperm.xlu0 %1211, %v776_v35  }
 0x133   :  { %1229 = vtanh.f32 %v490_v5 }
 0x134   :  { %1231 = vtanh.f32 %v491_v9  ;;  %v1824_v9 = vld [vmem:[#allocation8_spill] sm:$0xff] }
 0x135   :  { %811 = vperm.xlu1 %1212, %v777_v24  }
 0x136   :  { %816 = vperm.xlu0 %1211, %v778_v31  }
 0x139   :  { %821 = vperm.xlu1 %1212, %v779_v46   ;;  %v785_v46 = vld [vmem:[%s1796_s3 + $0x60] sm:$0xff] }
 0x13a   :  { %826 = vperm.xlu0 %1211, %v780_v48  }
 0x13d   :  { %831 = vperm.xlu1 %1212, %v781_v51  }
 0x13e   :  { %836 = vperm.xlu0 %1211, %v782_v53  }
 0x140   :  { %v1230_v54 = vpop.eup %1229 }
 0x141   :  { %v502_v55 = vrot.slane %v1230_v54, %v1377_v27  ;;  %v508_v56 = vrot.slane %v1230_v54, %v1379_v28  ;;  %v514_v58 = vrot.slane %v1230_v54, %v1381_v29  ;;  %v520_v61 = vrot.slane %v1230_v54, %v1383_v30  ;;  %v1232_v7 = vpop.eup %1231  ;;  %841 = vperm.xlu1 %1212, %v783_v15  }
 0x142   :  { %v526_v40 = vrot.slane %v1230_v54, %v1385_v32  ;;  %v532_v4 = vrot.slane %v1230_v54, %v1387_v33  ;;  %v538_v43 = vrot.slane %v1230_v54, %v1389_v34  ;;  %v544_v52 = vrot.slane %v1230_v54, %v1393_v36  ;;  %846 = vperm.xlu0 %1211, %v784_v1  }
 0x143   :  { %v503_v62 = vmul.f32 %v502_v55, %v1319_v16  ;;  %v504_v22 = vmul.f32 %v502_v55, %v1321_v17  ;;  %v509_v63 = vmul.f32 %v508_v56, %v1329_v21  ;;  %v510_v0 = vmul.f32 %v508_v56, %v1333_v23  ;;  %v786_v56 = vld [vmem:[%s1796_s3 + $0x68] sm:$0xff] }
 0x144   :  { %v515_v37 = vmul.f32 %v514_v58, %v1311_v12  ;;  %v516_v38 = vmul.f32 %v514_v58, %v1323_v18  ;;  %v521_v39 = vmul.f32 %v520_v61, %v1313_v13  ;;  %v522_v41 = vmul.f32 %v520_v61, %v1327_v20 }
 0x145   :  { %v527_v45 = vmul.f32 %v526_v40, %v1315_v14  ;;  %v528_v8 = vmul.f32 %v526_v40, %v1337_v25  ;;  %v533_v60 = vmul.f32 %v532_v4, %v1325_v19  ;;  %v534_v5 = vmul.f32 %v532_v4, %v1819_v50  ;;  %851 = vperm.xlu1 %1212, %v785_v46  }
 0x146   :  { %v539_v42 = vmul.f32 %v538_v43, %v1820_v59  ;;  %v540_v35 = vmul.f32 %v538_v43, %v1821_v44  ;;  %v545_v24 = vmul.f32 %v544_v52, %v1824_v9  ;;  %v546_v31 = vmul.f32 %v544_v52, %v1823_v47  ;;  %856 = vperm.xlu0 %1211, %v786_v56  }
 0x147   :  { %v550_v48 = vrot.slane %v1232_v7, %v1377_v27  ;;  %v556_v51 = vrot.slane %v1232_v7, %v1379_v28  ;;  %v559_v53 = vadd.f32 %v1107_v10, %v503_v62  ;;  %v560_v55 = vadd.f32 %v1108_v11, %v504_v22  ;;  %v787_v62 = vld [vmem:[%s1796_s3 + $0x70] sm:$0xff]  ;;  %v788_v10 = vld [vmem:[%s1796_s3 + $0x78] sm:$0xff] }
 0x148   :  { %v561_v58 = vadd.f32 %v515_v37, %v509_v63  ;;  %v562_v61 = vadd.f32 %v516_v38, %v510_v0  ;;  %v563_v40 = vadd.f32 %v527_v45, %v521_v39  ;;  %v564_v4 = vadd.f32 %v528_v8, %v522_v41 }
 0x149   :  { %v551_v43 = vmul.f32 %v550_v48, %v1339_v26  ;;  %v552_v52 = vmul.f32 %v550_v48, %v1363_v49  ;;  %v565_v15 = vadd.f32 %v539_v42, %v533_v60  ;;  %v566_v1 = vadd.f32 %v540_v35, %v534_v5  ;;  %861 = vperm.xlu1 %1212, %v787_v62  }
 0x14a   :  { %v569_v47 = vadd.f32 %v561_v58, %v559_v53  ;;  %v570_v9 = vadd.f32 %v562_v61, %v560_v55  ;;  %v1645_v63 = vadd.f32 %v1232_v7, %v1558_v3  ;;  %v494_v0 = vadd.f32 %v1230_v54, %v1560_v6  ;;  %866 = vperm.xlu0 %1211, %v788_v10   ;;  %v1109_v58 = vld [vmem:[%s1793_s0 + $0x60] sm:$0xff]  ;;  %v1110_v61 = vld [vmem:[%s1793_s0 + $0x68] sm:$0x3] }
 0x14b   :  { %v567_v22 = vadd.f32 %v551_v43, %v545_v24  ;;  %v557_v11 = vmul.f32 %v556_v51, %v1370_v57  ;;  %v568_v37 = vadd.f32 %v552_v52, %v546_v31  ;;  %v571_v38 = vadd.f32 %v565_v15, %v563_v40 }
 0x14c   :  { %1825 = vst [vmem:[#allocation6_spill] sm:$0xff] %v1645_v63  ;;  %v572_v39 = vadd.f32 %v566_v1, %v564_v4  ;;  %v558_v41 = vmul.f32 %v556_v51, %v1374_v2 }
 0x14d   :  { %v573_v45 = vadd.f32 %v567_v22, %v557_v11  ;;  %v575_v8 = vadd.f32 %v571_v38, %v569_v47 }
 0x14e   :  { %v576_v60 = vadd.f32 %v572_v39, %v570_v9  ;;  %v574_v3 = vadd.f32 %v568_v37, %v558_v41  ;;  %v1827_v37 = vld [vmem:[#allocation8_spill] sm:$0xff]  ;;  %v1828_v39 = vld [vmem:[#allocation9_spill] sm:$0xff] }
 0x14f   :  { %v577_v7 = vadd.f32 %v575_v8, %v573_v45 }
 0x150   :  { %v578_v5 = vadd.f32 %v576_v60, %v574_v3 }
 0x151   :  { %1233 = vtanh.f32 %v577_v7 }
 0x152   :  { %1235 = vtanh.f32 %v578_v5 }
 0x15e   :  { %v1234_v6 = vpop.eup %1233 }
 0x15f   :  { %v589_v54 = vrot.slane %v1234_v6, %v1377_v27  ;;  %v595_v42 = vrot.slane %v1234_v6, %v1379_v28  ;;  %v601_v35 = vrot.slane %v1234_v6, %v1381_v29  ;;  %v607_v24 = vrot.slane %v1234_v6, %v1383_v30  ;;  %v1665_v56 = vpop.eup %1235 }
 0x160   :  { %v613_v31 = vrot.slane %v1234_v6, %v1385_v32  ;;  %v619_v47 = vrot.slane %v1234_v6, %v1387_v33  ;;  %v625_v9 = vrot.slane %v1234_v6, %v1389_v34  ;;  %v631_v46 = vrot.slane %v1234_v6, %v1393_v36  ;;  %1826 = vst [vmem:[#allocation7_spill] sm:$0xff] %v1665_v56 }
 0x161   :  { %v590_v48 = vmul.f32 %v589_v54, %v1319_v16  ;;  %v591_v51 = vmul.f32 %v589_v54, %v1321_v17  ;;  %v596_v53 = vmul.f32 %v595_v42, %v1329_v21  ;;  %v597_v55 = vmul.f32 %v595_v42, %v1333_v23 }
 0x162   :  { %v602_v40 = vmul.f32 %v601_v35, %v1311_v12  ;;  %v603_v4 = vmul.f32 %v601_v35, %v1323_v18  ;;  %v608_v43 = vmul.f32 %v607_v24, %v1313_v13  ;;  %v609_v52 = vmul.f32 %v607_v24, %v1327_v20 }
 0x163   :  { %v614_v15 = vmul.f32 %v613_v31, %v1315_v14  ;;  %v615_v1 = vmul.f32 %v613_v31, %v1337_v25  ;;  %v620_v62 = vmul.f32 %v619_v47, %v1325_v19  ;;  %v621_v22 = vmul.f32 %v619_v47, %v1819_v50 }
 0x164   :  { %v626_v10 = vmul.f32 %v625_v9, %v1820_v59  ;;  %v627_v11 = vmul.f32 %v625_v9, %v1821_v44  ;;  %v632_v38 = vmul.f32 %v631_v46, %v1827_v37  ;;  %v633_v41 = vmul.f32 %v631_v46, %v1828_v39 }
 0x165   :  { %v637_v45 = vrot.slane %v1665_v56, %v1377_v27  ;;  %v643_v8 = vrot.slane %v1665_v56, %v1379_v28  ;;  %v646_v60 = vadd.f32 %v1109_v58, %v590_v48  ;;  %v647_v3 = vadd.f32 %v1110_v61, %v591_v51 }
 0x166   :  { %v648_v7 = vadd.f32 %v602_v40, %v596_v53  ;;  %v649_v5 = vadd.f32 %v603_v4, %v597_v55  ;;  %v650_v54 = vadd.f32 %v614_v15, %v608_v43  ;;  %v651_v42 = vadd.f32 %v615_v1, %v609_v52 }
 0x167   :  { %v638_v35 = vmul.f32 %v637_v45, %v1339_v26  ;;  %v639_v24 = vmul.f32 %v637_v45, %v1363_v49  ;;  %v652_v31 = vadd.f32 %v626_v10, %v620_v62  ;;  %v653_v47 = vadd.f32 %v627_v11, %v621_v22 }
 0x168   :  { %v656_v9 = vadd.f32 %v648_v7, %v646_v60  ;;  %v657_v46 = vadd.f32 %v649_v5, %v647_v3  ;;  %v1691_v59 = vadd.f32 %v1234_v6, %v494_v0  ;;  %v644_v56 = vmul.f32 %v643_v8, %v1370_v57  ;;  %v1829_v7 = vld [vmem:[#allocation5_spill] sm:$0xff]  ;;  %v1830_v5 = vld [vmem:[#allocation8_spill] sm:$0xff] }
 0x169   :  { %v654_v63 = vadd.f32 %v638_v35, %v632_v38  ;;  %v655_v37 = vadd.f32 %v639_v24, %v633_v41  ;;  %v645_v48 = vmul.f32 %v643_v8, %v1374_v2  ;;  %v658_v51 = vadd.f32 %v652_v31, %v650_v54 }
 0x16a   :  { %v659_v53 = vadd.f32 %v653_v47, %v651_v42 }
 0x16b   :  { %v660_v55 = vadd.f32 %v654_v63, %v644_v56  ;;  %v661_v58 = vadd.f32 %v655_v37, %v645_v48  ;;  %v662_v61 = vadd.f32 %v658_v51, %v656_v9  ;;  %v1112_v63 = vld [vmem:[%s1793_s0 + $0x78] sm:$0x3] }
 0x16c   :  { %v663_v40 = vadd.f32 %v659_v53, %v657_v46 }
 0x16d   :  { %v664_v4 = vadd.f32 %v662_v61, %v660_v55  ;;  %v1832_v61 = vld [vmem:[#allocation7_spill] sm:$0xff] }
 0x16e   :  { %v665_v43 = vadd.f32 %v663_v40, %v661_v58 }
 0x16f   :  { %1237 = vtanh.f32 %v664_v4 }
 0x170   :  { %1239 = vtanh.f32 %v665_v43 }
 0x17c   :  { %v1238_v52 = vpop.eup %1237 }
 0x17d   :  { %v1240_v15 = vpop.eup %1239  ;;  %v718_v1 = vrot.slane %v1238_v52, %v1393_v36  ;;  %v676_v0 = vrot.slane %v1238_v52, %v1377_v27  ;;  %v682_v6 = vrot.slane %v1238_v52, %v1379_v28  ;;  %v688_v62 = vrot.slane %v1238_v52, %v1381_v29 }
 0x17e   :  { %v724_v22 = vrot.slane %v1240_v15, %v1377_v27  ;;  %v694_v56 = vrot.slane %v1238_v52, %v1383_v30  ;;  %v700_v27 = vrot.slane %v1238_v52, %v1385_v32  ;;  %v706_v41 = vrot.slane %v1238_v52, %v1387_v33 }
 0x17f   :  { %v678_v10 = vmul.f32 %v676_v0, %v1321_v17  ;;  %v684_v11 = vmul.f32 %v682_v6, %v1333_v23  ;;  %v690_v36 = vmul.f32 %v688_v62, %v1323_v18  ;;  %v720_v37 = vmul.f32 %v718_v1, %v1828_v39 }
 0x180   :  { %v726_v38 = vmul.f32 %v724_v22, %v1363_v49  ;;  %v696_v29 = vmul.f32 %v694_v56, %v1327_v20  ;;  %v712_v45 = vrot.slane %v1238_v52, %v1389_v34  ;;  %v730_v30 = vrot.slane %v1240_v15, %v1379_v28  ;;  %v1111_v20 = vld [vmem:[%s1793_s0 + $0x70] sm:$0xff] }
 0x181   :  { %v734_v8 = vadd.f32 %v1112_v63, %v678_v10  ;;  %v736_v17 = vadd.f32 %v690_v36, %v684_v11  ;;  %v677_v23 = vmul.f32 %v676_v0, %v1319_v16  ;;  %v702_v18 = vmul.f32 %v700_v27, %v1337_v25  ;;  %v761_v63 = vld [vmem:[%s1795_s2 + $0x20] sm:$0xff]  ;;  %v762_v10 = vld [vmem:[%s1795_s2 + $0x28] sm:$0xff]  ;;  %v763_v36 = vld [vmem:[%s1795_s2 + $0x30] sm:$0xff] }
 0x182   :  { %v708_v39 = vmul.f32 %v706_v41, %v1819_v50  ;;  %v714_v49 = vmul.f32 %v712_v45, %v1821_v44  ;;  %v683_v32 = vmul.f32 %v682_v6, %v1329_v21  ;;  %v742_v33 = vadd.f32 %v726_v38, %v720_v37  ;;  %v758_v6 = vld [vmem:[%s1795_s2 + $0x8] sm:$0xff]  ;;  %v771_v37 = vld [vmem:[%s1795_s2 + $0x70] sm:$0xff]  ;;  %v764_v38 = vld [vmem:[%s1795_s2 + $0x38] sm:$0xff] }
 0x183   :  { %v744_v34 = vadd.f32 %v736_v17, %v734_v8  ;;  %v689_v60 = vmul.f32 %v688_v62, %v1311_v12  ;;  %v695_v28 = vmul.f32 %v694_v56, %v1313_v13  ;;  %v738_v3 = vadd.f32 %v702_v18, %v696_v29  ;;  %v766_v62 = vld [vmem:[%s1795_s2 + $0x48] sm:$0xff]  ;;  %v769_v56 = vld [vmem:[%s1795_s2 + $0x60] sm:$0xff]  ;;  %v772_v29 = vld [vmem:[%s1795_s2 + $0x78] sm:$0xff] }
 0x184   :  { %v740_v16 = vadd.f32 %v714_v49, %v708_v39  ;;  %v701_v25 = vmul.f32 %v700_v27, %v1315_v14  ;;  %v707_v50 = vmul.f32 %v706_v41, %v1325_v19  ;;  %v713_v44 = vmul.f32 %v712_v45, %v1829_v7  ;;  %v770_v11 = vld [vmem:[%s1795_s2 + $0x68] sm:$0xff] }
 0x185   :  { %v719_v54 = vmul.f32 %v718_v1, %v1830_v5  ;;  %v725_v42 = vmul.f32 %v724_v22, %v1339_v26  ;;  %v733_v35 = vadd.f32 %v1111_v20, %v677_v23  ;;  %v732_v21 = vmul.f32 %v730_v30, %v1374_v2  ;;  %v1831_v26 = vld [vmem:[#allocation6_spill] sm:$0xff]  ;;  %v768_v22 = vld [vmem:[%s1795_s2 + $0x58] sm:$0xff] }
 0x186   :  { %v746_v24 = vadd.f32 %v740_v16, %v738_v3  ;;  %v735_v31 = vadd.f32 %v689_v60, %v683_v32  ;;  %v737_v12 = vadd.f32 %v701_v25, %v695_v28  ;;  %v739_v47 = vadd.f32 %v713_v44, %v707_v50 }
 0x187   :  { %v741_v13 = vadd.f32 %v725_v42, %v719_v54  ;;  %v748_v9 = vadd.f32 %v742_v33, %v732_v21  ;;  %v731_v14 = vmul.f32 %v730_v30, %v1370_v57  ;;  %v582_v2 = vadd.f32 %v1832_v61, %v1831_v26 }
 0x188   :  { %v750_v46 = vadd.f32 %v746_v24, %v744_v34  ;;  %v743_v48 = vadd.f32 %v735_v31, %v733_v35  ;;  %v745_v19 = vadd.f32 %v739_v47, %v737_v12  ;;  %v668_v1 = vadd.f32 %v1238_v52, %v1691_v59  ;;  %v759_v59 = vld [vmem:[%s1795_s2 + $0x10] sm:$0xff] }
 0x189   :  { %v747_v53 = vadd.f32 %v741_v13, %v731_v14  ;;  %v669_v40 = vadd.f32 %v1240_v15, %v582_v2  ;;  %v767_v52 = vld [vmem:[%s1795_s2 + $0x50] sm:$0xff]  ;;  %v760_v15 = vld [vmem:[%s1795_s2 + $0x18] sm:$0xff]  ;;  %s1277_s2 = smov [#allocation2]  }
 0x18a   :  { %v752_v51 = vadd.f32 %v750_v46, %v748_v9  ;;  %v749_v55 = vadd.f32 %v745_v19, %v743_v48  ;;  %s1088_s30 = sshll.u32 %s1277_s2, 4  ;;  %s1089_s30 = int_to_ptr.vmem [resolvable:$true] %s1088_s30 }
 0x18b   :  { %s1245_s0 = scalar_lea.vmem %s1089_s30, 2048  ;;  %p1250_p1 = scmp.lt.s32.totalorder %s1089_s30, %s1089_s30 }
 0x18c   :  { %1241 = vtanh.f32 %v752_v51  ;;  %v751_v58 = vadd.f32 %v749_v55, %v747_v53  ;;  %p1246_p0 = scmp.ne.s32.totalorder %s1089_s30, %s1245_s0  ;;  %p1251_p2 = scmp.lt.s32.totalorder %s1245_s0, %s1245_s0 }
 0x18e   :  { %1243 = vtanh.f32 %v751_v58  ;;  %p1252_p3 = por %p1251_p2, %p1250_p1 }
 0x190   :  { %p1253_p4 = pnand %p1252_p3, %p1246_p0 }
 0x199   :  { %v1242_v4 = vpop.eup %1241 }
 0x19a   :  { %v756_v43 = vadd.f32 %v1242_v4, %v669_v40 }
 0x19b   :  { %v1244_v0 = vpop.eup %1243 }
 0x19c   :  { %1148 = vmatprep.subr.msk.mxu0 %vm918_vm1, %v756_v43  ;;  %1176 = vmatprep.subr.msk.mxu1 %vm918_vm1, %v756_v43  ;;  %v755_v57 = vadd.f32 %v1244_v0, %v668_v1 }
 0x19d   :  { %1149 = vmatpush3.msk.msra.mxu0 %vm918_vm1, %v756_v43  ;;  %1178 = vmatpush3.msk.msra.mxu1 %vm918_vm1, %v756_v43 }
 0x19e   :  { %1150 = vmatprep.subr.mxu0 %v755_v57  ;;  %1177 = vmatprep.subr.mxu1 %v755_v57 }
 0x19f   :  { %1151 = vmatpush3.msra.mxu0 %v755_v57  ;;  %1179 = vmatpush3.msra.mxu1 %v755_v57 }
 0x1a0   :  { %1153 = vmatmul.mubr.msk.f32.vlgmr.msra.gmra.mxu0 %vm869_vm0, %v758_v6  ;;  %1165 = vmatmul.mubr.msk.f32.vlgmr.msra.gmra.mxu1 %vm869_vm0, %v766_v62 }
 0x1a1   :  { %1155 = vmatprep.mubr.msk.f32.mxu0 %vm869_vm0, %v759_v59  ;;  %1167 = vmatprep.mubr.msk.f32.mxu1 %vm869_vm0, %v767_v52 }
 0x1a4   :  { %1156 = vmatmul.mubr.msk.f32.gmra.mxu0 %vm869_vm0, %v760_v15  ;;  %1168 = vmatmul.mubr.msk.f32.gmra.mxu1 %vm869_vm0, %v768_v22 }
 0x1a5   :  { %1158 = vmatprep.mubr.msk.f32.mxu0 %vm869_vm0, %v761_v63  ;;  %1170 = vmatprep.mubr.msk.f32.mxu1 %vm869_vm0, %v769_v56 }
 0x1a8   :  { %1159 = vmatmul.mubr.msk.f32.gmra.mxu0 %vm869_vm0, %v762_v10  ;;  %1171 = vmatmul.mubr.msk.f32.gmra.mxu1 %vm869_vm0, %v770_v11  ;;  %v797_v41 = vpop.permute.xlu1 %796 }
 0x1a9   :  { %1161 = vmatprep.mubr.msk.f32.mxu0 %vm869_vm0, %v763_v36  ;;  %1173 = vmatprep.mubr.msk.f32.mxu1 %vm869_vm0, %v771_v37  ;;  %v792_v27 = vpop.permute.xlu0 %791 }
 0x1ac   :  { %1162 = vmatmul.mubr.msk.f32.gmra.mxu0 %vm869_vm0, %v764_v38  ;;  %1174 = vmatmul.mubr.msk.f32.gmra.mxu1 %vm869_vm0, %v772_v29  ;;  %v802_v8 = vpop.permute.xlu1 %801 }
 0x1ad   :  { %v807_v45 = vpop.permute.xlu0 %806 }
 0x1b0   :  { %v812_v17 = vpop.permute.xlu1 %811 }
 0x1b1   :  { %v817_v30 = vpop.permute.xlu0 %816 }
 0x1b4   :  { %v822_v18 = vpop.permute.xlu1 %821 }
 0x1b5   :  { %v827_v23 = vpop.permute.xlu0 %826 }
 0x1b8   :  { %v832_v49 = vpop.permute.xlu1 %831 }
 0x1b9   :  { %v837_v39 = vpop.permute.xlu0 %836 }
 0x1bc   :  { %v842_v34 = vpop.permute.xlu1 %841 }
 0x1bd   :  { %v847_v20 = vpop.permute.xlu0 %846 }
 0x1c0   :  { %v852_v24 = vpop.permute.xlu1 %851 }
 0x1c1   :  { %v857_v5 = vpop.permute.xlu0 %856 }
 0x1c4   :  { %v862_v26 = vpop.permute.xlu1 %861 }
 0x1c5   :  { %v867_v19 = vpop.permute.xlu0 %866 }
 0x260   :  { %v1154_v32 = vpop.f32.mrf.mxu0  ;;  %v1166_v33 = vpop.f32.mrf.mxu1 }
 0x261   :  { %v994_v60 = vadd.f32 %v1154_v32, %v797_v41  ;;  %v1034_v28 = vadd.f32 %v1166_v33, %v837_v39 }
 0x262   :  { %v988_v3 = vpop.f32.mrf.mxu0  ;;  %v1028_v16 = vpop.f32.mrf.mxu1 }
 0x263   :  { %1068 = vst [vmem:[#allocation2 + $0x8] sm:$0xff] %v994_v60  ;;  %1076 = vst [vmem:[#allocation2 + $0x48] sm:$0xff] %v1034_v28  ;;  %v989_v25 = vadd.f32 %v988_v3, %v792_v27  ;;  %v1029_v50 = vadd.f32 %v1028_v16, %v832_v49 }
 0x264   :  { %v1157_v7 = vpop.f32.mrf.mxu0  ;;  %v1169_v44 = vpop.f32.mrf.mxu1 }
 0x265   :  { %1067 = vst [vmem:[#allocation2] sm:$0xff] %v989_v25  ;;  %1075 = vst [vmem:[#allocation2 + $0x40] sm:$0xff] %v1029_v50  ;;  %v1004_v54 = vadd.f32 %v1157_v7, %v807_v45  ;;  %v1044_v42 = vadd.f32 %v1169_v44, %v847_v20 }
 0x266   :  { %v998_v35 = vpop.f32.mrf.mxu0  ;;  %v1038_v21 = vpop.f32.mrf.mxu1 }
 0x267   :  { %1070 = vst [vmem:[#allocation2 + $0x18] sm:$0xff] %v1004_v54  ;;  %1078 = vst [vmem:[#allocation2 + $0x58] sm:$0xff] %v1044_v42  ;;  %v999_v31 = vadd.f32 %v998_v35, %v802_v8  ;;  %v1039_v12 = vadd.f32 %v1038_v21, %v842_v34 }
 0x268   :  { %v1160_v47 = vpop.f32.mrf.mxu0  ;;  %v1172_v13 = vpop.f32.mrf.mxu1 }
 0x269   :  { %1069 = vst [vmem:[#allocation2 + $0x10] sm:$0xff] %v999_v31  ;;  %1077 = vst [vmem:[#allocation2 + $0x50] sm:$0xff] %v1039_v12  ;;  %v1014_v9 = vadd.f32 %v1160_v47, %v817_v30  ;;  %v1054_v46 = vadd.f32 %v1172_v13, %v857_v5 }
 0x26a   :  { %v1008_v48 = vpop.f32.mrf.mxu0  ;;  %v1048_v14 = vpop.f32.mrf.mxu1 }
 0x26b   :  { %1072 = vst [vmem:[#allocation2 + $0x28] sm:$0xff] %v1014_v9  ;;  %1080 = vst [vmem:[#allocation2 + $0x68] sm:$0xff] %v1054_v46  ;;  %v1009_v51 = vadd.f32 %v1008_v48, %v812_v17  ;;  %v1049_v53 = vadd.f32 %v1048_v14, %v852_v24 }
 0x26c   :  { %v1163_v55 = vpop.f32.mrf.mxu0  ;;  %v1175_v58 = vpop.f32.mrf.mxu1 }
 0x26d   :  { %1071 = vst [vmem:[#allocation2 + $0x20] sm:$0xff] %v1009_v51  ;;  %1079 = vst [vmem:[#allocation2 + $0x60] sm:$0xff] %v1049_v53  ;;  %v1024_v61 = vadd.f32 %v1163_v55, %v827_v23  ;;  %v1064_v2 = vadd.f32 %v1175_v58, %v867_v19 }
 0x26e   :  { %v1018_v40 = vpop.f32.mrf.mxu0  ;;  %v1058_v4 = vpop.f32.mrf.mxu1 }
 0x26f   :  { %1074 = vst [vmem:[#allocation2 + $0x38] sm:$0xff] %v1024_v61  ;;  %1082 = vst [vmem:[#allocation2 + $0x78] sm:$0xff] %v1064_v2  ;;  %v1019_v43 = vadd.f32 %v1018_v40, %v822_v18  ;;  %v1059_v1 = vadd.f32 %v1058_v4, %v862_v26 }
 0x271   :  { %1073 = vst [vmem:[#allocation2 + $0x30] sm:$0xff] %v1019_v43  ;;  %1081 = vst [vmem:[#allocation2 + $0x70] sm:$0xff] %v1059_v1 }
 0x272   :  { %1256 = shalt.err (!%p1253_p4)
}
 0x273   :  { %s1278_s5 = smov 128   ;;  %s1279_s6 = smov 8  }
 0x274   :  { %1094 = dma.vmem_to_hbm [thread:$0]  %s1089_s30, 2048, %s1797_s4, [#allocation3], %s1278_s5, %s1278_s5, %s1279_s6  }
 0x275   :  { %1265 = dma.done.wait [#allocation3], 2048  }
 0x276   :  { %1266 = vsyncadd [#allocation3], 4294965248 }
 0x277   :  { %1098 = vsyncpa [#allocation3], 1 }

</bundles_post_ra>
